<compile_context>
chip_gen: v7x
topology: tpu7x:2x2x1
jax: 0.10.0
libtpu: 0.0.40
codegen_flags: <defaults>
</compile_context>

<pallas_src>
import functools
import math

import jax
import jax.numpy as jnp
from jax import lax
from jax.experimental import pallas as pl
from jax.experimental.pallas import tpu as pltpu


def _layer_norm(x, gamma, beta, eps):
    # PyTorch LayerNorm: biased variance over last dim (f32).
    mu = jnp.mean(x, axis=-1, keepdims=True)
    var = jnp.mean((x - mu) ** 2, axis=-1, keepdims=True)
    return (x - mu) * lax.rsqrt(var + eps) * gamma + beta


def _gelu_exact(x):
    # nn.GELU() default (approximate='none'): 0.5 * x * (1 + erf(x / sqrt(2)))
    return 0.5 * x * (1.0 + lax.erf(x * (1.0 / math.sqrt(2.0))))


def _vit_layer_kernel(x_ref,
                      g1_ref, be1_ref, g2_ref, be2_ref,
                      wqkv_ref, wproj_ref, bproj_ref,
                      w1_ref, bm1_ref, w2_ref, bm2_ref,
                      o_ref,
                      qkv_sc, attn_sc,
                      *, nhead, eps, n_valid, compute_dtype):
    bt, n_pad, d_model = x_ref.shape
    head_dim = d_model // nhead
    cdt = compute_dtype
    rows = bt * n_pad

    x = x_ref[...].astype(jnp.float32)                                  # (Bt, Np, D)

    # ---------------- attention branch ----------------
    xn = _layer_norm(x, g1_ref[...], be1_ref[...], eps)                 # (Bt, Np, D) f32

    # One lane-dense QKV projection for all heads and all batch elements in this block.
    # Wqkv is bf16 with 1/sqrt(hd) pre-folded into the Q columns; accumulate in f32.
    qkv = jnp.dot(xn.reshape(rows, d_model).astype(cdt), wqkv_ref[...],
                  preferred_element_type=jnp.float32)                   # (Bt*Np, 3D)
    qkv_sc[...] = qkv.astype(cdt)

    # Additive key-padding bias, computed once (only traced when padding was actually added).
    if n_pad > n_valid:
        kbias = jnp.where(
            lax.broadcasted_iota(jnp.int32, (1, n_pad), 1) < n_valid,
            0.0, -1e30).astype(jnp.float32)                             # (1, Np)
    else:
        kbias = None

    # dot_general contracting the last dim of both operands: A @ B^T with NO transpose op.
    dn_t = (((1,), (1,)), ((), ()))

    # TODO(synk): for very large nhead, switch this unrolled loop to lax.fori_loop / a grid
    # axis; here per-head liveness is already bounded by the ref-mediated loads/stores.
    for b in range(bt):
        r0 = b * n_pad
        for h in range(nhead):
            c0 = h * head_dim
            q = qkv_sc[r0:r0 + n_pad, c0:c0 + head_dim]                          # (Np, hd)
            k = qkv_sc[r0:r0 + n_pad, d_model + c0:d_model + c0 + head_dim]
            v = qkv_sc[r0:r0 + n_pad, 2 * d_model + c0:2 * d_model + c0 + head_dim]

            s = lax.dot_general(q, k, dn_t,
                                preferred_element_type=jnp.float32)              # (Np, Np)
            if kbias is not None:
                s = s + kbias
            s = s - jnp.max(s, axis=-1, keepdims=True)
            p = jnp.exp(s)                                                       # f32
            p = p * pl.reciprocal(jnp.sum(p, axis=-1, keepdims=True), approx=True)

            o = jnp.dot(p.astype(cdt), v,
                        preferred_element_type=jnp.float32)                      # (Np, hd)
            # Concat-layout store at lane offset h*hd -> projection below is one K=D matmul.
            attn_sc[r0:r0 + n_pad, c0:c0 + head_dim] = o.astype(cdt)

    attn = jnp.dot(attn_sc[...], wproj_ref[...],
                   preferred_element_type=jnp.float32)                  # (Bt*Np, D) lane-dense
    x1 = x + attn.reshape(bt, n_pad, d_model) + bproj_ref[...]          # residual 1 (f32)

    # ---------------- MLP branch ----------------
    xn2 = _layer_norm(x1, g2_ref[...], be2_ref[...], eps)
    h1 = jnp.dot(xn2.reshape(rows, d_model).astype(cdt), w1_ref[...],
                 preferred_element_type=jnp.float32) + bm1_ref[...]     # (Bt*Np, dim_mlp)
    h1 = _gelu_exact(h1)                                                # f32
    h2 = jnp.dot(h1.astype(cdt), w2_ref[...],
                 preferred_element_type=jnp.float32) + bm2_ref[...]     # (Bt*Np, D)

    o_ref[...] = (x1 + h2.reshape(bt, n_pad, d_model)).astype(o_ref.dtype)  # residual 2


def vit_encoder_layer(x, params, *, nhead, eps=1e-6, token_multiple=None,
                      batch_block=None, compute_dtype=jnp.bfloat16,
                      vmem_limit_bytes=48 * 1024 * 1024):
    B, N, D = x.shape
    assert D % nhead == 0
    hd = D // nhead

    # Pad tokens: >=16 rows for bf16 sublane packing at short sequences; 128-aligned at
    # production sequence lengths (e.g. N=197 -> 256) for MXU shaping.
    if token_multiple is None:
        token_multiple = 128 if N >= 128 else 16
    n_pad = ((N + token_multiple - 1) // token_multiple) * token_multiple
    x_p = x if n_pad == N else jnp.pad(x, ((0, 0), (0, n_pad - N), (0, 0)))

    # Block several batch elements per grid step when tiles are tiny (amortize per-step
    # pipeline overhead); keep one element per step at production shapes.
    if batch_block is None:
        cap = max(1, 256 // n_pad)
        batch_block = 1
        for bb in range(1, min(B, cap) + 1):
            if B % bb == 0:
                batch_block = bb
    assert B % batch_block == 0

    # Host-side weight prep:
    #  * fold 1/sqrt(hd) into the Q columns of the fused qkv weight,
    #  * cast matmul weights to compute_dtype (bf16 by default),
    #  * keep LayerNorm params and biases in f32 (elementwise math stays f32).
    f32 = lambda a: a.astype(jnp.float32)
    wqkv = f32(params["wqkv"])
    wqkv = wqkv.at[:, :D].multiply(hd ** -0.5).astype(compute_dtype)    # (D, 3D)
    wproj = params["wproj"].astype(compute_dtype)                       # (D, D)
    w1 = params["w1"].astype(compute_dtype)                             # (D, dim_mlp)
    w2 = params["w2"].astype(compute_dtype)                             # (dim_mlp, D)

    weight_args = [f32(params["g1"]), f32(params["be1"]),
                   f32(params["g2"]), f32(params["be2"]),
                   wqkv, wproj, f32(params["bproj"]),
                   w1, f32(params["bm1"]), w2, f32(params["bm2"])]

    # Parameters: whole-array, single-copy VMEM residents (no per-grid-step double buffering).
    # TODO(synk): on v7x (64 MiB VMEM) tile w1/w2 over a hidden-dim grid axis instead.
    wspec = pl.BlockSpec(memory_space=pltpu.MemorySpace.VMEM)

    kernel = functools.partial(_vit_layer_kernel, nhead=nhead, eps=eps,
                               n_valid=N, compute_dtype=compute_dtype)
    out = pl.pallas_call(
        kernel,
        out_shape=jax.ShapeDtypeStruct((B, n_pad, D), x.dtype),
        grid_spec=pltpu.PrefetchScalarGridSpec(
            num_scalar_prefetch=0,
            grid=(B // batch_block,),
            in_specs=[pl.BlockSpec((batch_block, n_pad, D), lambda b: (b, 0, 0))]
                     + [wspec] * len(weight_args),
            out_specs=pl.BlockSpec((batch_block, n_pad, D), lambda b: (b, 0, 0)),
            scratch_shapes=[
                pltpu.VMEM((batch_block * n_pad, 3 * D), compute_dtype),   # fused qkv
                pltpu.VMEM((batch_block * n_pad, D), compute_dtype),       # concat attn out
            ],
        ),
        compiler_params=pltpu.CompilerParams(
            dimension_semantics=("parallel",),
            vmem_limit_bytes=vmem_limit_bytes,
        ),
    )(x_p, *weight_args)

    return out[:, :N, :] if n_pad != N else out


def vit_encoder_layer_ref(x, params, *, nhead, eps=1e-6):
    """Pure-JAX f32 reference (same math), for correctness checking."""
    B, N, D = x.shape
    hd = D // nhead

    def ln(v, g, b):
        mu = jnp.mean(v, -1, keepdims=True)
        var = jnp.mean((v - mu) ** 2, -1, keepdims=True)
        return (v - mu) / jnp.sqrt(var + eps) * g + b

    xn = ln(x, params["g1"], params["be1"])
    qkv = xn @ params["wqkv"]                                # (B, N, 3D)
    q, k, v = jnp.split(qkv, 3, axis=-1)
    q = q.reshape(B, N, nhead, hd).transpose(0, 2, 1, 3)
    k = k.reshape(B, N, nhead, hd).transpose(0, 2, 1, 3)
    v = v.reshape(B, N, nhead, hd).transpose(0, 2, 1, 3)
    s = jnp.einsum("bhqd,bhkd->bhqk", q, k) * (hd ** -0.5)
    p = jax.nn.softmax(s, axis=-1)
    a = jnp.einsum("bhqk,bhkd->bhqd", p, v).transpose(0, 2, 1, 3).reshape(B, N, D)
    a = a @ params["wproj"] + params["bproj"]
    x1 = x + a
    xn2 = ln(x1, params["g2"], params["be2"])
    h = xn2 @ params["w1"] + params["bm1"]
    h = 0.5 * h * (1.0 + lax.erf(h / math.sqrt(2.0)))
    return x1 + h @ params["w2"] + params["bm2"]


if __name__ == "__main__":
    # Small shapes consistent with the module: batch=2, seq=10, d_model=32, nhead=4, dim_mlp=64.
    # N=10 is deliberately NOT a multiple of the token padding so key-masking is exercised.
    B, N, D, H, DIM_MLP = 2, 10, 32, 4, 64

    key = jax.random.PRNGKey(0)
    ks = jax.random.split(key, 8)
    x = jax.random.normal(ks[0], (B, N, D), jnp.float32)

    std = 0.02
    params = {
        # LayerNorm params (PyTorch init: weight=1, bias=0)
        "g1":  jnp.ones((1, D), jnp.float32),
        "be1": jnp.zeros((1, D), jnp.float32),
        "g2":  jnp.ones((1, D), jnp.float32),
        "be2": jnp.zeros((1, D), jnp.float32),
        # Attention: fused qkv Linear (qkv_bias=False -> no bias), out projection (with bias).
        # Linear weights are pre-transposed to (in_features, out_features).
        "wqkv":  std * jax.random.normal(ks[1], (D, 3 * D), jnp.float32),
        "wproj": std * jax.random.normal(ks[2], (D, D), jnp.float32),
        "bproj": std * jax.random.normal(ks[3], (1, D), jnp.float32),
        # MLP: Linear(D, dim_mlp) -> GELU -> Linear(dim_mlp, D)
        "w1":  std * jax.random.normal(ks[4], (D, DIM_MLP), jnp.float32),
        "bm1": std * jax.random.normal(ks[5], (1, DIM_MLP), jnp.float32),
        "w2":  std * jax.random.normal(ks[6], (DIM_MLP, D), jnp.float32),
        "bm2": std * jax.random.normal(ks[7], (1, D), jnp.float32),
    }

    ref = vit_encoder_layer_ref(x, params, nhead=H)

    # Exact (f32) compute path: only deviation is the EUP approximate reciprocal in softmax.
    out_f32 = jax.block_until_ready(
        vit_encoder_layer(x, params, nhead=H, compute_dtype=jnp.float32))
    assert out_f32.shape == (B, N, D) and out_f32.dtype == jnp.float32
    assert jnp.allclose(out_f32, ref, atol=1e-3, rtol=1e-3), "f32 path mismatch vs reference"

    # Default (bf16 operands, f32 accumulation) compute path: looser tolerance for bf16 casts.
    out_bf16 = jax.block_until_ready(vit_encoder_layer(x, params, nhead=H))
    assert out_bf16.shape == (B, N, D) and out_bf16.dtype == jnp.float32
    assert jnp.allclose(out_bf16, ref, atol=2e-2, rtol=2e-2), "bf16 path mismatch vs reference"

    print("KERNEL_OK")
</pallas_src>

<mosaic_0001>
module attributes {stable_mosaic.version = 11 : i64} {
  func.func @_vit_layer_kernel(%arg0: i32, %arg1: memref<2x16x32xf32, #tpu.memory_space<vmem>>, %arg2: memref<1x32xf32, #tpu.memory_space<vmem>>, %arg3: memref<1x32xf32, #tpu.memory_space<vmem>>, %arg4: memref<1x32xf32, #tpu.memory_space<vmem>>, %arg5: memref<1x32xf32, #tpu.memory_space<vmem>>, %arg6: memref<32x96xf32, #tpu.memory_space<vmem>>, %arg7: memref<32x32xf32, #tpu.memory_space<vmem>>, %arg8: memref<1x32xf32, #tpu.memory_space<vmem>>, %arg9: memref<32x64xf32, #tpu.memory_space<vmem>>, %arg10: memref<1x64xf32, #tpu.memory_space<vmem>>, %arg11: memref<64x32xf32, #tpu.memory_space<vmem>>, %arg12: memref<1x32xf32, #tpu.memory_space<vmem>>, %arg13: memref<2x16x32xf32, #tpu.memory_space<vmem>>, %arg14: memref<32x96xf32, #tpu.memory_space<vmem>>, %arg15: memref<32x32xf32, #tpu.memory_space<vmem>>) attributes {dimension_semantics = [#tpu.dimension_semantics<parallel>], iteration_bounds = array<i64: 1>, scalar_prefetch = 0 : i64, scratch_operands = 2 : i64, tpu.core_type = #tpu.core_type<tc>, window_params = [{transform_indices = @transform_0, window_bounds = array<i64: 2, 16, 32>}, {pipeline_mode = #tpu.pipeline_mode<synchronous>, transform_indices = @transform_1, window_bounds = array<i64: 1, 32>}, {pipeline_mode = #tpu.pipeline_mode<synchronous>, transform_indices = @transform_2, window_bounds = array<i64: 1, 32>}, {pipeline_mode = #tpu.pipeline_mode<synchronous>, transform_indices = @transform_3, window_bounds = array<i64: 1, 32>}, {pipeline_mode = #tpu.pipeline_mode<synchronous>, transform_indices = @transform_4, window_bounds = array<i64: 1, 32>}, {pipeline_mode = #tpu.pipeline_mode<synchronous>, transform_indices = @transform_5, window_bounds = array<i64: 32, 96>}, {pipeline_mode = #tpu.pipeline_mode<synchronous>, transform_indices = @transform_6, window_bounds = array<i64: 32, 32>}, {pipeline_mode = #tpu.pipeline_mode<synchronous>, transform_indices = @transform_7, window_bounds = array<i64: 1, 32>}, {pipeline_mode = #tpu.pipeline_mode<synchronous>, transform_indices = @transform_8, window_bounds = array<i64: 32, 64>}, {pipeline_mode = #tpu.pipeline_mode<synchronous>, transform_indices = @transform_9, window_bounds = array<i64: 1, 64>}, {pipeline_mode = #tpu.pipeline_mode<synchronous>, transform_indices = @transform_10, window_bounds = array<i64: 64, 32>}, {pipeline_mode = #tpu.pipeline_mode<synchronous>, transform_indices = @transform_11, window_bounds = array<i64: 1, 32>}, {transform_indices = @transform_12, window_bounds = array<i64: 2, 16, 32>}]} {
    %c0 = arith.constant 0 : index
    %c0_0 = arith.constant 0 : index
    %c0_1 = arith.constant 0 : index
    %0 = vector.load %arg1[%c0, %c0_0, %c0_1] : memref<2x16x32xf32, #tpu.memory_space<vmem>>, vector<2x16x32xf32>
    %c0_2 = arith.constant 0 : index
    %c0_3 = arith.constant 0 : index
    %1 = vector.load %arg2[%c0_2, %c0_3] : memref<1x32xf32, #tpu.memory_space<vmem>>, vector<1x32xf32>
    %c0_4 = arith.constant 0 : index
    %c0_5 = arith.constant 0 : index
    %2 = vector.load %arg3[%c0_4, %c0_5] : memref<1x32xf32, #tpu.memory_space<vmem>>, vector<1x32xf32>
    %cst = arith.constant dense<0.000000e+00> : vector<2x16xf32>
    %3 = vector.multi_reduction <add>, %0, %cst [2] : vector<2x16x32xf32> to vector<2x16xf32>
    %4 = vector.shape_cast %3 : vector<2x16xf32> to vector<2x16x1xf32>
    %cst_6 = arith.constant 3.200000e+01 : f32
    %5 = vector.broadcast %cst_6 : f32 to vector<2x16x1xf32>
    %6 = arith.divf %4, %5 : vector<2x16x1xf32>
    %7 = vector.broadcast %6 : vector<2x16x1xf32> to vector<2x16x32xf32>
    %8 = arith.subf %0, %7 : vector<2x16x32xf32>
    %9 = arith.mulf %8, %8 : vector<2x16x32xf32>
    %cst_7 = arith.constant dense<0.000000e+00> : vector<2x16xf32>
    %10 = vector.multi_reduction <add>, %9, %cst_7 [2] : vector<2x16x32xf32> to vector<2x16xf32>
    %11 = vector.shape_cast %10 : vector<2x16xf32> to vector<2x16x1xf32>
    %cst_8 = arith.constant 3.200000e+01 : f32
    %12 = vector.broadcast %cst_8 : f32 to vector<2x16x1xf32>
    %13 = arith.divf %11, %12 : vector<2x16x1xf32>
    %14 = vector.broadcast %6 : vector<2x16x1xf32> to vector<2x16x32xf32>
    %15 = arith.subf %0, %14 : vector<2x16x32xf32>
    %cst_9 = arith.constant 9.99999997E-7 : f32
    %16 = vector.broadcast %cst_9 : f32 to vector<2x16x1xf32>
    %17 = arith.addf %13, %16 : vector<2x16x1xf32>
    %18 = math.rsqrt %17 : vector<2x16x1xf32>
    %19 = vector.broadcast %18 : vector<2x16x1xf32> to vector<2x16x32xf32>
    %20 = arith.mulf %15, %19 : vector<2x16x32xf32>
    %21 = vector.shape_cast %1 : vector<1x32xf32> to vector<1x1x32xf32>
    %22 = vector.broadcast %21 : vector<1x1x32xf32> to vector<2x16x32xf32>
    %23 = arith.mulf %20, %22 : vector<2x16x32xf32>
    %24 = vector.shape_cast %2 : vector<1x32xf32> to vector<1x1x32xf32>
    %25 = vector.broadcast %24 : vector<1x1x32xf32> to vector<2x16x32xf32>
    %26 = arith.addf %23, %25 : vector<2x16x32xf32>
    %27 = vector.shape_cast %26 : vector<2x16x32xf32> to vector<32x32xf32>
    %c0_10 = arith.constant 0 : index
    %c0_11 = arith.constant 0 : index
    %28 = vector.load %arg6[%c0_10, %c0_11] : memref<32x96xf32, #tpu.memory_space<vmem>>, vector<32x96xf32>
    %cst_12 = arith.constant dense<0.000000e+00> : vector<32x96xf32>
    %29 = tpu.matmul %27, %28, %cst_12 {dimension_numbers = #tpu.dot_dimension_numbers<[1], [0], [0], [1], [0, 0, 1, 1], [], []>} : vector<32x32xf32>, vector<32x96xf32>, vector<32x96xf32> -> vector<32x96xf32>
    %c0_13 = arith.constant 0 : index
    %c0_14 = arith.constant 0 : index
    %30 = vector.load %arg14[%c0_13, %c0_14] : memref<32x96xf32, #tpu.memory_space<vmem>>, vector<32x96xf32>
    tpu.vector_store %arg14[%c0_13, %c0_14], %29 {strides = array<i32>} : memref<32x96xf32, #tpu.memory_space<vmem>>, vector<32x96xf32>,
    %31 = tpu.iota {dimensions = array<i32: 1>} : vector<1x16xi32>
    %c10_i32 = arith.constant 10 : i32
    %32 = vector.broadcast %c10_i32 : i32 to vector<1x16xi32>
    %33 = arith.cmpi slt, %31, %32 : vector<1x16xi32>
    %cst_15 = arith.constant 0.000000e+00 : f32
    %cst_16 = arith.constant -1.000000e+30 : f32
    %34 = vector.broadcast %cst_15 : f32 to vector<1x16xf32>
    %35 = vector.broadcast %cst_16 : f32 to vector<1x16xf32>
    %36 = arith.select %33, %34, %35 : vector<1x16xi1>, vector<1x16xf32>
    %c0_17 = arith.constant 0 : index
    %c0_18 = arith.constant 0 : index
    %37 = vector.load %arg14[%c0_17, %c0_18] : memref<32x96xf32, #tpu.memory_space<vmem>>, vector<16x8xf32>
    %c0_19 = arith.constant 0 : index
    %c32 = arith.constant 32 : index
    %38 = vector.load %arg14[%c0_19, %c32] : memref<32x96xf32, #tpu.memory_space<vmem>>, vector<16x8xf32>
    %c0_20 = arith.constant 0 : index
    %c64 = arith.constant 64 : index
    %39 = vector.load %arg14[%c0_20, %c64] : memref<32x96xf32, #tpu.memory_space<vmem>>, vector<16x8xf32>
    %cst_21 = arith.constant dense<0.000000e+00> : vector<16x16xf32>
    %40 = tpu.matmul %37, %38, %cst_21 {dimension_numbers = #tpu.dot_dimension_numbers<[1], [1], [0], [0], [0, 0, 1, 0], [], []>} : vector<16x8xf32>, vector<16x8xf32>, vector<16x16xf32> -> vector<16x16xf32>
    %41 = vector.broadcast %36 : vector<1x16xf32> to vector<16x16xf32>
    %42 = arith.addf %40, %41 : vector<16x16xf32>
    %cst_22 = arith.constant dense<0xFF800000> : vector<16xf32>
    %43 = vector.multi_reduction <maximumf>, %42, %cst_22 [1] : vector<16x16xf32> to vector<16xf32>
    %44 = vector.shape_cast %43 : vector<16xf32> to vector<16x1xf32>
    %45 = vector.broadcast %44 : vector<16x1xf32> to vector<16x16xf32>
    %46 = arith.subf %42, %45 : vector<16x16xf32>
    %47 = math.exp %46 : vector<16x16xf32>
    %cst_23 = arith.constant dense<0.000000e+00> : vector<16xf32>
    %48 = vector.multi_reduction <add>, %47, %cst_23 [1] : vector<16x16xf32> to vector<16xf32>
    %49 = vector.shape_cast %48 : vector<16xf32> to vector<16x1xf32>
    %50 = tpu.reciprocal %49 {approx = true} : vector<16x1xf32> -> vector<16x1xf32>
    %51 = vector.broadcast %50 : vector<16x1xf32> to vector<16x16xf32>
    %52 = arith.mulf %47, %51 : vector<16x16xf32>
    %cst_24 = arith.constant dense<0.000000e+00> : vector<16x8xf32>
    %53 = tpu.matmul %52, %39, %cst_24 {dimension_numbers = #tpu.dot_dimension_numbers<[1], [0], [0], [1], [0, 0, 1, 1], [], []>} : vector<16x16xf32>, vector<16x8xf32>, vector<16x8xf32> -> vector<16x8xf32>
    %c0_25 = arith.constant 0 : index
    %c0_26 = arith.constant 0 : index
    %54 = vector.load %arg15[%c0_25, %c0_26] : memref<32x32xf32, #tpu.memory_space<vmem>>, vector<16x8xf32>
    tpu.vector_store %arg15[%c0_25, %c0_26], %53 {strides = array<i32>} : memref<32x32xf32, #tpu.memory_space<vmem>>, vector<16x8xf32>,
    %c0_27 = arith.constant 0 : index
    %c8 = arith.constant 8 : index
    %55 = vector.load %arg14[%c0_27, %c8] : memref<32x96xf32, #tpu.memory_space<vmem>>, vector<16x8xf32>
    %c0_28 = arith.constant 0 : index
    %c40 = arith.constant 40 : index
    %56 = vector.load %arg14[%c0_28, %c40] : memref<32x96xf32, #tpu.memory_space<vmem>>, vector<16x8xf32>
    %c0_29 = arith.constant 0 : index
    %c72 = arith.constant 72 : index
    %57 = vector.load %arg14[%c0_29, %c72] : memref<32x96xf32, #tpu.memory_space<vmem>>, vector<16x8xf32>
    %cst_30 = arith.constant dense<0.000000e+00> : vector<16x16xf32>
    %58 = tpu.matmul %55, %56, %cst_30 {dimension_numbers = #tpu.dot_dimension_numbers<[1], [1], [0], [0], [0, 0, 1, 0], [], []>} : vector<16x8xf32>, vector<16x8xf32>, vector<16x16xf32> -> vector<16x16xf32>
    %59 = vector.broadcast %36 : vector<1x16xf32> to vector<16x16xf32>
    %60 = arith.addf %58, %59 : vector<16x16xf32>
    %cst_31 = arith.constant dense<0xFF800000> : vector<16xf32>
    %61 = vector.multi_reduction <maximumf>, %60, %cst_31 [1] : vector<16x16xf32> to vector<16xf32>
    %62 = vector.shape_cast %61 : vector<16xf32> to vector<16x1xf32>
    %63 = vector.broadcast %62 : vector<16x1xf32> to vector<16x16xf32>
    %64 = arith.subf %60, %63 : vector<16x16xf32>
    %65 = math.exp %64 : vector<16x16xf32>
    %cst_32 = arith.constant dense<0.000000e+00> : vector<16xf32>
    %66 = vector.multi_reduction <add>, %65, %cst_32 [1] : vector<16x16xf32> to vector<16xf32>
    %67 = vector.shape_cast %66 : vector<16xf32> to vector<16x1xf32>
    %68 = tpu.reciprocal %67 {approx = true} : vector<16x1xf32> -> vector<16x1xf32>
    %69 = vector.broadcast %68 : vector<16x1xf32> to vector<16x16xf32>
    %70 = arith.mulf %65, %69 : vector<16x16xf32>
    %cst_33 = arith.constant dense<0.000000e+00> : vector<16x8xf32>
    %71 = tpu.matmul %70, %57, %cst_33 {dimension_numbers = #tpu.dot_dimension_numbers<[1], [0], [0], [1], [0, 0, 1, 1], [], []>} : vector<16x16xf32>, vector<16x8xf32>, vector<16x8xf32> -> vector<16x8xf32>
    %c0_34 = arith.constant 0 : index
    %c8_35 = arith.constant 8 : index
    %72 = vector.load %arg15[%c0_34, %c8_35] : memref<32x32xf32, #tpu.memory_space<vmem>>, vector<16x8xf32>
    tpu.vector_store %arg15[%c0_34, %c8_35], %71 {strides = array<i32>} : memref<32x32xf32, #tpu.memory_space<vmem>>, vector<16x8xf32>,
    %c0_36 = arith.constant 0 : index
    %c16 = arith.constant 16 : index
    %73 = vector.load %arg14[%c0_36, %c16] : memref<32x96xf32, #tpu.memory_space<vmem>>, vector<16x8xf32>
    %c0_37 = arith.constant 0 : index
    %c48 = arith.constant 48 : index
    %74 = vector.load %arg14[%c0_37, %c48] : memref<32x96xf32, #tpu.memory_space<vmem>>, vector<16x8xf32>
    %c0_38 = arith.constant 0 : index
    %c80 = arith.constant 80 : index
    %75 = vector.load %arg14[%c0_38, %c80] : memref<32x96xf32, #tpu.memory_space<vmem>>, vector<16x8xf32>
    %cst_39 = arith.constant dense<0.000000e+00> : vector<16x16xf32>
    %76 = tpu.matmul %73, %74, %cst_39 {dimension_numbers = #tpu.dot_dimension_numbers<[1], [1], [0], [0], [0, 0, 1, 0], [], []>} : vector<16x8xf32>, vector<16x8xf32>, vector<16x16xf32> -> vector<16x16xf32>
    %77 = vector.broadcast %36 : vector<1x16xf32> to vector<16x16xf32>
    %78 = arith.addf %76, %77 : vector<16x16xf32>
    %cst_40 = arith.constant dense<0xFF800000> : vector<16xf32>
    %79 = vector.multi_reduction <maximumf>, %78, %cst_40 [1] : vector<16x16xf32> to vector<16xf32>
    %80 = vector.shape_cast %79 : vector<16xf32> to vector<16x1xf32>
    %81 = vector.broadcast %80 : vector<16x1xf32> to vector<16x16xf32>
    %82 = arith.subf %78, %81 : vector<16x16xf32>
    %83 = math.exp %82 : vector<16x16xf32>
    %cst_41 = arith.constant dense<0.000000e+00> : vector<16xf32>
    %84 = vector.multi_reduction <add>, %83, %cst_41 [1] : vector<16x16xf32> to vector<16xf32>
    %85 = vector.shape_cast %84 : vector<16xf32> to vector<16x1xf32>
    %86 = tpu.reciprocal %85 {approx = true} : vector<16x1xf32> -> vector<16x1xf32>
    %87 = vector.broadcast %86 : vector<16x1xf32> to vector<16x16xf32>
    %88 = arith.mulf %83, %87 : vector<16x16xf32>
    %cst_42 = arith.constant dense<0.000000e+00> : vector<16x8xf32>
    %89 = tpu.matmul %88, %75, %cst_42 {dimension_numbers = #tpu.dot_dimension_numbers<[1], [0], [0], [1], [0, 0, 1, 1], [], []>} : vector<16x16xf32>, vector<16x8xf32>, vector<16x8xf32> -> vector<16x8xf32>
    %c0_43 = arith.constant 0 : index
    %c16_44 = arith.constant 16 : index
    %90 = vector.load %arg15[%c0_43, %c16_44] : memref<32x32xf32, #tpu.memory_space<vmem>>, vector<16x8xf32>
    tpu.vector_store %arg15[%c0_43, %c16_44], %89 {strides = array<i32>} : memref<32x32xf32, #tpu.memory_space<vmem>>, vector<16x8xf32>,
    %c0_45 = arith.constant 0 : index
    %c24 = arith.constant 24 : index
    %91 = vector.load %arg14[%c0_45, %c24] : memref<32x96xf32, #tpu.memory_space<vmem>>, vector<16x8xf32>
    %c0_46 = arith.constant 0 : index
    %c56 = arith.constant 56 : index
    %92 = vector.load %arg14[%c0_46, %c56] : memref<32x96xf32, #tpu.memory_space<vmem>>, vector<16x8xf32>
    %c0_47 = arith.constant 0 : index
    %c88 = arith.constant 88 : index
    %93 = vector.load %arg14[%c0_47, %c88] : memref<32x96xf32, #tpu.memory_space<vmem>>, vector<16x8xf32>
    %cst_48 = arith.constant dense<0.000000e+00> : vector<16x16xf32>
    %94 = tpu.matmul %91, %92, %cst_48 {dimension_numbers = #tpu.dot_dimension_numbers<[1], [1], [0], [0], [0, 0, 1, 0], [], []>} : vector<16x8xf32>, vector<16x8xf32>, vector<16x16xf32> -> vector<16x16xf32>
    %95 = vector.broadcast %36 : vector<1x16xf32> to vector<16x16xf32>
    %96 = arith.addf %94, %95 : vector<16x16xf32>
    %cst_49 = arith.constant dense<0xFF800000> : vector<16xf32>
    %97 = vector.multi_reduction <maximumf>, %96, %cst_49 [1] : vector<16x16xf32> to vector<16xf32>
    %98 = vector.shape_cast %97 : vector<16xf32> to vector<16x1xf32>
    %99 = vector.broadcast %98 : vector<16x1xf32> to vector<16x16xf32>
    %100 = arith.subf %96, %99 : vector<16x16xf32>
    %101 = math.exp %100 : vector<16x16xf32>
    %cst_50 = arith.constant dense<0.000000e+00> : vector<16xf32>
    %102 = vector.multi_reduction <add>, %101, %cst_50 [1] : vector<16x16xf32> to vector<16xf32>
    %103 = vector.shape_cast %102 : vector<16xf32> to vector<16x1xf32>
    %104 = tpu.reciprocal %103 {approx = true} : vector<16x1xf32> -> vector<16x1xf32>
    %105 = vector.broadcast %104 : vector<16x1xf32> to vector<16x16xf32>
    %106 = arith.mulf %101, %105 : vector<16x16xf32>
    %cst_51 = arith.constant dense<0.000000e+00> : vector<16x8xf32>
    %107 = tpu.matmul %106, %93, %cst_51 {dimension_numbers = #tpu.dot_dimension_numbers<[1], [0], [0], [1], [0, 0, 1, 1], [], []>} : vector<16x16xf32>, vector<16x8xf32>, vector<16x8xf32> -> vector<16x8xf32>
    %c0_52 = arith.constant 0 : index
    %c24_53 = arith.constant 24 : index
    %108 = vector.load %arg15[%c0_52, %c24_53] : memref<32x32xf32, #tpu.memory_space<vmem>>, vector<16x8xf32>
    tpu.vector_store %arg15[%c0_52, %c24_53], %107 {strides = array<i32>} : memref<32x32xf32, #tpu.memory_space<vmem>>, vector<16x8xf32>,
    %c16_54 = arith.constant 16 : index
    %c0_55 = arith.constant 0 : index
    %109 = vector.load %arg14[%c16_54, %c0_55] : memref<32x96xf32, #tpu.memory_space<vmem>>, vector<16x8xf32>
    %c16_56 = arith.constant 16 : index
    %c32_57 = arith.constant 32 : index
    %110 = vector.load %arg14[%c16_56, %c32_57] : memref<32x96xf32, #tpu.memory_space<vmem>>, vector<16x8xf32>
    %c16_58 = arith.constant 16 : index
    %c64_59 = arith.constant 64 : index
    %111 = vector.load %arg14[%c16_58, %c64_59] : memref<32x96xf32, #tpu.memory_space<vmem>>, vector<16x8xf32>
    %cst_60 = arith.constant dense<0.000000e+00> : vector<16x16xf32>
    %112 = tpu.matmul %109, %110, %cst_60 {dimension_numbers = #tpu.dot_dimension_numbers<[1], [1], [0], [0], [0, 0, 1, 0], [], []>} : vector<16x8xf32>, vector<16x8xf32>, vector<16x16xf32> -> vector<16x16xf32>
    %113 = vector.broadcast %36 : vector<1x16xf32> to vector<16x16xf32>
    %114 = arith.addf %112, %113 : vector<16x16xf32>
    %cst_61 = arith.constant dense<0xFF800000> : vector<16xf32>
    %115 = vector.multi_reduction <maximumf>, %114, %cst_61 [1] : vector<16x16xf32> to vector<16xf32>
    %116 = vector.shape_cast %115 : vector<16xf32> to vector<16x1xf32>
    %117 = vector.broadcast %116 : vector<16x1xf32> to vector<16x16xf32>
    %118 = arith.subf %114, %117 : vector<16x16xf32>
    %119 = math.exp %118 : vector<16x16xf32>
    %cst_62 = arith.constant dense<0.000000e+00> : vector<16xf32>
    %120 = vector.multi_reduction <add>, %119, %cst_62 [1] : vector<16x16xf32> to vector<16xf32>
    %121 = vector.shape_cast %120 : vector<16xf32> to vector<16x1xf32>
    %122 = tpu.reciprocal %121 {approx = true} : vector<16x1xf32> -> vector<16x1xf32>
    %123 = vector.broadcast %122 : vector<16x1xf32> to vector<16x16xf32>
    %124 = arith.mulf %119, %123 : vector<16x16xf32>
    %cst_63 = arith.constant dense<0.000000e+00> : vector<16x8xf32>
    %125 = tpu.matmul %124, %111, %cst_63 {dimension_numbers = #tpu.dot_dimension_numbers<[1], [0], [0], [1], [0, 0, 1, 1], [], []>} : vector<16x16xf32>, vector<16x8xf32>, vector<16x8xf32> -> vector<16x8xf32>
    %c16_64 = arith.constant 16 : index
    %c0_65 = arith.constant 0 : index
    %126 = vector.load %arg15[%c16_64, %c0_65] : memref<32x32xf32, #tpu.memory_space<vmem>>, vector<16x8xf32>
    tpu.vector_store %arg15[%c16_64, %c0_65], %125 {strides = array<i32>} : memref<32x32xf32, #tpu.memory_space<vmem>>, vector<16x8xf32>,
    %c16_66 = arith.constant 16 : index
    %c8_67 = arith.constant 8 : index
    %127 = vector.load %arg14[%c16_66, %c8_67] : memref<32x96xf32, #tpu.memory_space<vmem>>, vector<16x8xf32>
    %c16_68 = arith.constant 16 : index
    %c40_69 = arith.constant 40 : index
    %128 = vector.load %arg14[%c16_68, %c40_69] : memref<32x96xf32, #tpu.memory_space<vmem>>, vector<16x8xf32>
    %c16_70 = arith.constant 16 : index
    %c72_71 = arith.constant 72 : index
    %129 = vector.load %arg14[%c16_70, %c72_71] : memref<32x96xf32, #tpu.memory_space<vmem>>, vector<16x8xf32>
    %cst_72 = arith.constant dense<0.000000e+00> : vector<16x16xf32>
    %130 = tpu.matmul %127, %128, %cst_72 {dimension_numbers = #tpu.dot_dimension_numbers<[1], [1], [0], [0], [0, 0, 1, 0], [], []>} : vector<16x8xf32>, vector<16x8xf32>, vector<16x16xf32> -> vector<16x16xf32>
    %131 = vector.broadcast %36 : vector<1x16xf32> to vector<16x16xf32>
    %132 = arith.addf %130, %131 : vector<16x16xf32>
    %cst_73 = arith.constant dense<0xFF800000> : vector<16xf32>
    %133 = vector.multi_reduction <maximumf>, %132, %cst_73 [1] : vector<16x16xf32> to vector<16xf32>
    %134 = vector.shape_cast %133 : vector<16xf32> to vector<16x1xf32>
    %135 = vector.broadcast %134 : vector<16x1xf32> to vector<16x16xf32>
    %136 = arith.subf %132, %135 : vector<16x16xf32>
    %137 = math.exp %136 : vector<16x16xf32>
    %cst_74 = arith.constant dense<0.000000e+00> : vector<16xf32>
    %138 = vector.multi_reduction <add>, %137, %cst_74 [1] : vector<16x16xf32> to vector<16xf32>
    %139 = vector.shape_cast %138 : vector<16xf32> to vector<16x1xf32>
    %140 = tpu.reciprocal %139 {approx = true} : vector<16x1xf32> -> vector<16x1xf32>
    %141 = vector.broadcast %140 : vector<16x1xf32> to vector<16x16xf32>
    %142 = arith.mulf %137, %141 : vector<16x16xf32>
    %cst_75 = arith.constant dense<0.000000e+00> : vector<16x8xf32>
    %143 = tpu.matmul %142, %129, %cst_75 {dimension_numbers = #tpu.dot_dimension_numbers<[1], [0], [0], [1], [0, 0, 1, 1], [], []>} : vector<16x16xf32>, vector<16x8xf32>, vector<16x8xf32> -> vector<16x8xf32>
    %c16_76 = arith.constant 16 : index
    %c8_77 = arith.constant 8 : index
    %144 = vector.load %arg15[%c16_76, %c8_77] : memref<32x32xf32, #tpu.memory_space<vmem>>, vector<16x8xf32>
    tpu.vector_store %arg15[%c16_76, %c8_77], %143 {strides = array<i32>} : memref<32x32xf32, #tpu.memory_space<vmem>>, vector<16x8xf32>,
    %c16_78 = arith.constant 16 : index
    %c16_79 = arith.constant 16 : index
    %145 = vector.load %arg14[%c16_78, %c16_79] : memref<32x96xf32, #tpu.memory_space<vmem>>, vector<16x8xf32>
    %c16_80 = arith.constant 16 : index
    %c48_81 = arith.constant 48 : index
    %146 = vector.load %arg14[%c16_80, %c48_81] : memref<32x96xf32, #tpu.memory_space<vmem>>, vector<16x8xf32>
    %c16_82 = arith.constant 16 : index
    %c80_83 = arith.constant 80 : index
    %147 = vector.load %arg14[%c16_82, %c80_83] : memref<32x96xf32, #tpu.memory_space<vmem>>, vector<16x8xf32>
    %cst_84 = arith.constant dense<0.000000e+00> : vector<16x16xf32>
    %148 = tpu.matmul %145, %146, %cst_84 {dimension_numbers = #tpu.dot_dimension_numbers<[1], [1], [0], [0], [0, 0, 1, 0], [], []>} : vector<16x8xf32>, vector<16x8xf32>, vector<16x16xf32> -> vector<16x16xf32>
    %149 = vector.broadcast %36 : vector<1x16xf32> to vector<16x16xf32>
    %150 = arith.addf %148, %149 : vector<16x16xf32>
    %cst_85 = arith.constant dense<0xFF800000> : vector<16xf32>
    %151 = vector.multi_reduction <maximumf>, %150, %cst_85 [1] : vector<16x16xf32> to vector<16xf32>
    %152 = vector.shape_cast %151 : vector<16xf32> to vector<16x1xf32>
    %153 = vector.broadcast %152 : vector<16x1xf32> to vector<16x16xf32>
    %154 = arith.subf %150, %153 : vector<16x16xf32>
    %155 = math.exp %154 : vector<16x16xf32>
    %cst_86 = arith.constant dense<0.000000e+00> : vector<16xf32>
    %156 = vector.multi_reduction <add>, %155, %cst_86 [1] : vector<16x16xf32> to vector<16xf32>
    %157 = vector.shape_cast %156 : vector<16xf32> to vector<16x1xf32>
    %158 = tpu.reciprocal %157 {approx = true} : vector<16x1xf32> -> vector<16x1xf32>
    %159 = vector.broadcast %158 : vector<16x1xf32> to vector<16x16xf32>
    %160 = arith.mulf %155, %159 : vector<16x16xf32>
    %cst_87 = arith.constant dense<0.000000e+00> : vector<16x8xf32>
    %161 = tpu.matmul %160, %147, %cst_87 {dimension_numbers = #tpu.dot_dimension_numbers<[1], [0], [0], [1], [0, 0, 1, 1], [], []>} : vector<16x16xf32>, vector<16x8xf32>, vector<16x8xf32> -> vector<16x8xf32>
    %c16_88 = arith.constant 16 : index
    %c16_89 = arith.constant 16 : index
    %162 = vector.load %arg15[%c16_88, %c16_89] : memref<32x32xf32, #tpu.memory_space<vmem>>, vector<16x8xf32>
    tpu.vector_store %arg15[%c16_88, %c16_89], %161 {strides = array<i32>} : memref<32x32xf32, #tpu.memory_space<vmem>>, vector<16x8xf32>,
    %c16_90 = arith.constant 16 : index
    %c24_91 = arith.constant 24 : index
    %163 = vector.load %arg14[%c16_90, %c24_91] : memref<32x96xf32, #tpu.memory_space<vmem>>, vector<16x8xf32>
    %c16_92 = arith.constant 16 : index
    %c56_93 = arith.constant 56 : index
    %164 = vector.load %arg14[%c16_92, %c56_93] : memref<32x96xf32, #tpu.memory_space<vmem>>, vector<16x8xf32>
    %c16_94 = arith.constant 16 : index
    %c88_95 = arith.constant 88 : index
    %165 = vector.load %arg14[%c16_94, %c88_95] : memref<32x96xf32, #tpu.memory_space<vmem>>, vector<16x8xf32>
    %cst_96 = arith.constant dense<0.000000e+00> : vector<16x16xf32>
    %166 = tpu.matmul %163, %164, %cst_96 {dimension_numbers = #tpu.dot_dimension_numbers<[1], [1], [0], [0], [0, 0, 1, 0], [], []>} : vector<16x8xf32>, vector<16x8xf32>, vector<16x16xf32> -> vector<16x16xf32>
    %167 = vector.broadcast %36 : vector<1x16xf32> to vector<16x16xf32>
    %168 = arith.addf %166, %167 : vector<16x16xf32>
    %cst_97 = arith.constant dense<0xFF800000> : vector<16xf32>
    %169 = vector.multi_reduction <maximumf>, %168, %cst_97 [1] : vector<16x16xf32> to vector<16xf32>
    %170 = vector.shape_cast %169 : vector<16xf32> to vector<16x1xf32>
    %171 = vector.broadcast %170 : vector<16x1xf32> to vector<16x16xf32>
    %172 = arith.subf %168, %171 : vector<16x16xf32>
    %173 = math.exp %172 : vector<16x16xf32>
    %cst_98 = arith.constant dense<0.000000e+00> : vector<16xf32>
    %174 = vector.multi_reduction <add>, %173, %cst_98 [1] : vector<16x16xf32> to vector<16xf32>
    %175 = vector.shape_cast %174 : vector<16xf32> to vector<16x1xf32>
    %176 = tpu.reciprocal %175 {approx = true} : vector<16x1xf32> -> vector<16x1xf32>
    %177 = vector.broadcast %176 : vector<16x1xf32> to vector<16x16xf32>
    %178 = arith.mulf %173, %177 : vector<16x16xf32>
    %cst_99 = arith.constant dense<0.000000e+00> : vector<16x8xf32>
    %179 = tpu.matmul %178, %165, %cst_99 {dimension_numbers = #tpu.dot_dimension_numbers<[1], [0], [0], [1], [0, 0, 1, 1], [], []>} : vector<16x16xf32>, vector<16x8xf32>, vector<16x8xf32> -> vector<16x8xf32>
    %c16_100 = arith.constant 16 : index
    %c24_101 = arith.constant 24 : index
    %180 = vector.load %arg15[%c16_100, %c24_101] : memref<32x32xf32, #tpu.memory_space<vmem>>, vector<16x8xf32>
    tpu.vector_store %arg15[%c16_100, %c24_101], %179 {strides = array<i32>} : memref<32x32xf32, #tpu.memory_space<vmem>>, vector<16x8xf32>,
    %c0_102 = arith.constant 0 : index
    %c0_103 = arith.constant 0 : index
    %181 = vector.load %arg15[%c0_102, %c0_103] : memref<32x32xf32, #tpu.memory_space<vmem>>, vector<32x32xf32>
    %c0_104 = arith.constant 0 : index
    %c0_105 = arith.constant 0 : index
    %182 = vector.load %arg7[%c0_104, %c0_105] : memref<32x32xf32, #tpu.memory_space<vmem>>, vector<32x32xf32>
    %cst_106 = arith.constant dense<0.000000e+00> : vector<32x32xf32>
    %183 = tpu.matmul %181, %182, %cst_106 {dimension_numbers = #tpu.dot_dimension_numbers<[1], [0], [0], [1], [0, 0, 1, 1], [], []>} : vector<32x32xf32>, vector<32x32xf32>, vector<32x32xf32> -> vector<32x32xf32>
    %184 = vector.shape_cast %183 : vector<32x32xf32> to vector<2x16x32xf32>
    %185 = arith.addf %0, %184 : vector<2x16x32xf32>
    %c0_107 = arith.constant 0 : index
    %c0_108 = arith.constant 0 : index
    %186 = vector.load %arg8[%c0_107, %c0_108] : memref<1x32xf32, #tpu.memory_space<vmem>>, vector<1x32xf32>
    %187 = vector.shape_cast %186 : vector<1x32xf32> to vector<1x1x32xf32>
    %188 = vector.broadcast %187 : vector<1x1x32xf32> to vector<2x16x32xf32>
    %189 = arith.addf %185, %188 : vector<2x16x32xf32>
    %c0_109 = arith.constant 0 : index
    %c0_110 = arith.constant 0 : index
    %190 = vector.load %arg4[%c0_109, %c0_110] : memref<1x32xf32, #tpu.memory_space<vmem>>, vector<1x32xf32>
    %c0_111 = arith.constant 0 : index
    %c0_112 = arith.constant 0 : index
    %191 = vector.load %arg5[%c0_111, %c0_112] : memref<1x32xf32, #tpu.memory_space<vmem>>, vector<1x32xf32>
    %cst_113 = arith.constant dense<0.000000e+00> : vector<2x16xf32>
    %192 = vector.multi_reduction <add>, %189, %cst_113 [2] : vector<2x16x32xf32> to vector<2x16xf32>
    %193 = vector.shape_cast %192 : vector<2x16xf32> to vector<2x16x1xf32>
    %cst_114 = arith.constant 3.200000e+01 : f32
    %194 = vector.broadcast %cst_114 : f32 to vector<2x16x1xf32>
    %195 = arith.divf %193, %194 : vector<2x16x1xf32>
    %196 = vector.broadcast %195 : vector<2x16x1xf32> to vector<2x16x32xf32>
    %197 = arith.subf %189, %196 : vector<2x16x32xf32>
    %198 = arith.mulf %197, %197 : vector<2x16x32xf32>
    %cst_115 = arith.constant dense<0.000000e+00> : vector<2x16xf32>
    %199 = vector.multi_reduction <add>, %198, %cst_115 [2] : vector<2x16x32xf32> to vector<2x16xf32>
    %200 = vector.shape_cast %199 : vector<2x16xf32> to vector<2x16x1xf32>
    %cst_116 = arith.constant 3.200000e+01 : f32
    %201 = vector.broadcast %cst_116 : f32 to vector<2x16x1xf32>
    %202 = arith.divf %200, %201 : vector<2x16x1xf32>
    %203 = vector.broadcast %195 : vector<2x16x1xf32> to vector<2x16x32xf32>
    %204 = arith.subf %189, %203 : vector<2x16x32xf32>
    %cst_117 = arith.constant 9.99999997E-7 : f32
    %205 = vector.broadcast %cst_117 : f32 to vector<2x16x1xf32>
    %206 = arith.addf %202, %205 : vector<2x16x1xf32>
    %207 = math.rsqrt %206 : vector<2x16x1xf32>
    %208 = vector.broadcast %207 : vector<2x16x1xf32> to vector<2x16x32xf32>
    %209 = arith.mulf %204, %208 : vector<2x16x32xf32>
    %210 = vector.shape_cast %190 : vector<1x32xf32> to vector<1x1x32xf32>
    %211 = vector.broadcast %210 : vector<1x1x32xf32> to vector<2x16x32xf32>
    %212 = arith.mulf %209, %211 : vector<2x16x32xf32>
    %213 = vector.shape_cast %191 : vector<1x32xf32> to vector<1x1x32xf32>
    %214 = vector.broadcast %213 : vector<1x1x32xf32> to vector<2x16x32xf32>
    %215 = arith.addf %212, %214 : vector<2x16x32xf32>
    %216 = vector.shape_cast %215 : vector<2x16x32xf32> to vector<32x32xf32>
    %c0_118 = arith.constant 0 : index
    %c0_119 = arith.constant 0 : index
    %217 = vector.load %arg9[%c0_118, %c0_119] : memref<32x64xf32, #tpu.memory_space<vmem>>, vector<32x64xf32>
    %cst_120 = arith.constant dense<0.000000e+00> : vector<32x64xf32>
    %218 = tpu.matmul %216, %217, %cst_120 {dimension_numbers = #tpu.dot_dimension_numbers<[1], [0], [0], [1], [0, 0, 1, 1], [], []>} : vector<32x32xf32>, vector<32x64xf32>, vector<32x64xf32> -> vector<32x64xf32>
    %c0_121 = arith.constant 0 : index
    %c0_122 = arith.constant 0 : index
    %219 = vector.load %arg10[%c0_121, %c0_122] : memref<1x64xf32, #tpu.memory_space<vmem>>, vector<1x64xf32>
    %220 = vector.broadcast %219 : vector<1x64xf32> to vector<32x64xf32>
    %221 = arith.addf %218, %220 : vector<32x64xf32>
    %cst_123 = arith.constant 5.000000e-01 : f32
    %222 = vector.broadcast %cst_123 : f32 to vector<32x64xf32>
    %223 = arith.mulf %222, %221 : vector<32x64xf32>
    %cst_124 = arith.constant 0.707106769 : f32
    %224 = vector.broadcast %cst_124 : f32 to vector<32x64xf32>
    %225 = arith.mulf %221, %224 : vector<32x64xf32>
    %226 = math.erf %225 : vector<32x64xf32>
    %cst_125 = arith.constant 1.000000e+00 : f32
    %227 = vector.broadcast %cst_125 : f32 to vector<32x64xf32>
    %228 = arith.addf %227, %226 : vector<32x64xf32>
    %229 = arith.mulf %223, %228 : vector<32x64xf32>
    %c0_126 = arith.constant 0 : index
    %c0_127 = arith.constant 0 : index
    %230 = vector.load %arg11[%c0_126, %c0_127] : memref<64x32xf32, #tpu.memory_space<vmem>>, vector<64x32xf32>
    %cst_128 = arith.constant dense<0.000000e+00> : vector<32x32xf32>
    %231 = tpu.matmul %229, %230, %cst_128 {dimension_numbers = #tpu.dot_dimension_numbers<[1], [0], [0], [1], [0, 0, 1, 1], [], []>} : vector<32x64xf32>, vector<64x32xf32>, vector<32x32xf32> -> vector<32x32xf32>
    %c0_129 = arith.constant 0 : index
    %c0_130 = arith.constant 0 : index
    %232 = vector.load %arg12[%c0_129, %c0_130] : memref<1x32xf32, #tpu.memory_space<vmem>>, vector<1x32xf32>
    %233 = vector.broadcast %232 : vector<1x32xf32> to vector<32x32xf32>
    %234 = arith.addf %231, %233 : vector<32x32xf32>
    %235 = vector.shape_cast %234 : vector<32x32xf32> to vector<2x16x32xf32>
    %236 = arith.addf %189, %235 : vector<2x16x32xf32>
    %c0_131 = arith.constant 0 : index
    %c0_132 = arith.constant 0 : index
    %c0_133 = arith.constant 0 : index
    %237 = vector.load %arg13[%c0_131, %c0_132, %c0_133] : memref<2x16x32xf32, #tpu.memory_space<vmem>>, vector<2x16x32xf32>
    tpu.vector_store %arg13[%c0_131, %c0_132, %c0_133], %236 {strides = array<i32>} : memref<2x16x32xf32, #tpu.memory_space<vmem>>, vector<2x16x32xf32>,
    return
  }
  func.func @transform_0(%arg0: i32) -> (i32, i32, i32) {
    %c0_i32 = arith.constant 0 : i32
    %c0_i32_0 = arith.constant 0 : i32
    %c0_i32_1 = arith.constant 0 : i32
    return %arg0, %c0_i32, %c0_i32_0 : i32, i32, i32
  }
  func.func @transform_1(%arg0: i32) -> (i32, i32) {
    %c0_i32 = arith.constant 0 : i32
    %c0_i32_0 = arith.constant 0 : i32
    %c0_i32_1 = arith.constant 0 : i32
    return %c0_i32, %c0_i32_0 : i32, i32
  }
  func.func @transform_2(%arg0: i32) -> (i32, i32) {
    %c0_i32 = arith.constant 0 : i32
    %c0_i32_0 = arith.constant 0 : i32
    %c0_i32_1 = arith.constant 0 : i32
    return %c0_i32, %c0_i32_0 : i32, i32
  }
  func.func @transform_3(%arg0: i32) -> (i32, i32) {
    %c0_i32 = arith.constant 0 : i32
    %c0_i32_0 = arith.constant 0 : i32
    %c0_i32_1 = arith.constant 0 : i32
    return %c0_i32, %c0_i32_0 : i32, i32
  }
  func.func @transform_4(%arg0: i32) -> (i32, i32) {
    %c0_i32 = arith.constant 0 : i32
    %c0_i32_0 = arith.constant 0 : i32
    %c0_i32_1 = arith.constant 0 : i32
    return %c0_i32, %c0_i32_0 : i32, i32
  }
  func.func @transform_5(%arg0: i32) -> (i32, i32) {
    %c0_i32 = arith.constant 0 : i32
    %c0_i32_0 = arith.constant 0 : i32
    %c0_i32_1 = arith.constant 0 : i32
    return %c0_i32, %c0_i32_0 : i32, i32
  }
  func.func @transform_6(%arg0: i32) -> (i32, i32) {
    %c0_i32 = arith.constant 0 : i32
    %c0_i32_0 = arith.constant 0 : i32
    %c0_i32_1 = arith.constant 0 : i32
    return %c0_i32, %c0_i32_0 : i32, i32
  }
  func.func @transform_7(%arg0: i32) -> (i32, i32) {
    %c0_i32 = arith.constant 0 : i32
    %c0_i32_0 = arith.constant 0 : i32
    %c0_i32_1 = arith.constant 0 : i32
    return %c0_i32, %c0_i32_0 : i32, i32
  }
  func.func @transform_8(%arg0: i32) -> (i32, i32) {
    %c0_i32 = arith.constant 0 : i32
    %c0_i32_0 = arith.constant 0 : i32
    %c0_i32_1 = arith.constant 0 : i32
    return %c0_i32, %c0_i32_0 : i32, i32
  }
  func.func @transform_9(%arg0: i32) -> (i32, i32) {
    %c0_i32 = arith.constant 0 : i32
    %c0_i32_0 = arith.constant 0 : i32
    %c0_i32_1 = arith.constant 0 : i32
    return %c0_i32, %c0_i32_0 : i32, i32
  }
  func.func @transform_10(%arg0: i32) -> (i32, i32) {
    %c0_i32 = arith.constant 0 : i32
    %c0_i32_0 = arith.constant 0 : i32
    %c0_i32_1 = arith.constant 0 : i32
    return %c0_i32, %c0_i32_0 : i32, i32
  }
  func.func @transform_11(%arg0: i32) -> (i32, i32) {
    %c0_i32 = arith.constant 0 : i32
    %c0_i32_0 = arith.constant 0 : i32
    %c0_i32_1 = arith.constant 0 : i32
    return %c0_i32, %c0_i32_0 : i32, i32
  }
  func.func @transform_12(%arg0: i32) -> (i32, i32, i32) {
    %c0_i32 = arith.constant 0 : i32
    %c0_i32_0 = arith.constant 0 : i32
    %c0_i32_1 = arith.constant 0 : i32
    return %arg0, %c0_i32, %c0_i32_0 : i32, i32, i32
  }
}

</mosaic_0001>

<bundles_post_ra>
// kernel: tpu_custom_call.1
= control target key start
LH: loop header
LB: loop body
LE: loop exit
PB: predicated region body
PF: predicated region fallthrough
CT: control target
= control target key end

     0   :  { %17 = vsyncpa [#allocation5], 0  ;;  %s3666_s0 = inlined_call_operand.vmem [shape: f32[2,16,32], index: 0, kind: input, shape index: {}]   ;;  %s3667_s1 = inlined_call_operand.vmem [shape: f32[1,32], index: 1, kind: input, shape index: {}]   ;;  %s3668_s2 = inlined_call_operand.vmem [shape: f32[1,32], index: 2, kind: input, shape index: {}]   ;;  %s3669_s3 = inlined_call_operand.vmem [shape: f32[1,32], index: 3, kind: input, shape index: {}]   ;;  %s3670_s4 = inlined_call_operand.vmem [shape: f32[1,32], index: 4, kind: input, shape index: {}]   ;;  %s3671_s5 = inlined_call_operand.vmem [shape: f32[32,96], index: 5, kind: input, shape index: {}]   ;;  %s3672_s6 = inlined_call_operand.vmem [shape: f32[32,32], index: 6, kind: input, shape index: {}]   ;;  %s3673_s7 = inlined_call_operand.vmem [shape: f32[1,32], index: 7, kind: input, shape index: {}]   ;;  %s3674_s8 = inlined_call_operand.hbm [shape: f32[32,64], index: 8, kind: input, shape index: {}]   ;;  %s3675_s9 = inlined_call_operand.hbm [shape: f32[1,64], index: 9, kind: input, shape index: {}]   ;;  %s3676_s10 = inlined_call_operand.vmem [shape: f32[64,32], index: 10, kind: input, shape index: {}]   ;;  %s3677_s11 = inlined_call_operand.vmem [shape: f32[1,32], index: 11, kind: input, shape index: {}]   ;;  %s3678_s12 = inlined_call_operand.hbm [shape: f32[2,16,32], index: 12, kind: output, shape index: {}]  }
   0x1   :  { %18 = vsyncpa [#allocation8], 0 }
   0x2   :  { %19 = vsyncpa [#allocation6], 0  ;;  %s3142_s21 = smov [#allocation4]   ;;  %s3070_s25 = scalar_lea.hbm %s3674_s8, 512 }
   0x3   :  { %s41_s22 = sshll.u32 %s3142_s21, 4  ;;  %p3071_p0 = scmp.ne.s32.totalorder %s3674_s8, %s3070_s25  ;;  %s42_s22 = int_to_ptr.vmem [resolvable:$true] %s41_s22 }
   0x4   :  { %p3074_p1 = scmp.lt.u32.totalorder %s3070_s25, %s3674_s8 }
   0x6   :  { %p3076_p2 = pnand %p3074_p1, %p3071_p0 }
   0x8   :  { %3079 = shalt.err (!%p3076_p2)
}
   0x9   :  { %s3080_s30 = scalar_lea.vmem %s42_s22, 512  ;;  %p3085_p4 = scmp.lt.s32.totalorder %s42_s22, %s42_s22 }
   0xa   :  { %p3081_p3 = scmp.ne.s32.totalorder %s42_s22, %s3080_s30  ;;  %p3086_p5 = scmp.lt.s32.totalorder %s3080_s30, %s3080_s30 }
   0xc   :  { %p3087_p6 = por %p3086_p5, %p3085_p4 }
   0xe   :  { %p3088_p7 = pnand %p3087_p6, %p3081_p3 }
  0x10   :  { %3091 = shalt.err (!%p3088_p7)
}
  0x11   :  { %s3143_s13 = smov 128   ;;  %s3144_s14 = smov 8  }
  0x12   :  { %47 = dma.hbm_to_vmem [thread:$0]  %s3674_s8, 512, %s42_s22, [#allocation5], %s3143_s13, %s3143_s13, %s3144_s14  }
  0x13   :  { %s3145_s17 = smov [#allocation7]   ;;  %s3092_s21 = scalar_lea.hbm %s3675_s9, 16 }
  0x14   :  { %s54_s18 = sshll.u32 %s3145_s17, 4  ;;  %p3093_p8 = scmp.ne.s32.totalorder %s3675_s9, %s3092_s21  ;;  %s55_s18 = int_to_ptr.vmem [resolvable:$true] %s54_s18 }
  0x15   :  { %p3096_p9 = scmp.lt.u32.totalorder %s3092_s21, %s3675_s9 }
  0x17   :  { %p3098_p10 = pnand %p3096_p9, %p3093_p8 }
  0x19   :  { %3101 = shalt.err (!%p3098_p10)
}
  0x1a   :  { %s3102_s27 = scalar_lea.vmem %s55_s18, 16  ;;  %s3106_s8 = scalar_lea.vmem %s55_s18, 32 }
  0x1b   :  { %p3103_p11 = scmp.ne.s32.totalorder %s55_s18, %s3102_s27  ;;  %p3107_p12 = scmp.lt.s32.totalorder %s55_s18, %s55_s18 }
  0x1c   :  { %p3108_p13 = scmp.lt.s32.totalorder %s3106_s8, %s3102_s27 }
  0x1e   :  { %p3109_p0 = por %p3108_p13, %p3107_p12 }
  0x20   :  { %p3110_p1 = pnand %p3109_p0, %p3103_p11 }
  0x22   :  { %3113 = shalt.err (!%p3110_p1)
}
  0x23   :  { %57 = dma.hbm_to_vmem [thread:$0]  %s3675_s9, 16, %s55_s18, [#allocation8]  }
  0x24   :  { %3136 = dma.done.wait [#allocation5], 512  }
  0x25   :  { %3137 = vsyncadd [#allocation5], 4294966784 }
  0x26   :  { %3138 = dma.done.wait [#allocation8], 16  }
  0x27   :  { %3139 = vsyncadd [#allocation8], 4294967280  ;;  %vm74_vm0 = vcmask 261120   ;;  %v68_v0 = vld [vmem:[%s3666_s0] sm:$0xff]  ;;  %v69_v1 = vld [vmem:[%s3666_s0 + $0x8] sm:$0xff]  ;;  %vm249_vm1 = vcmask 785408  }
  0x28   :  { %v75_v2 = vsel %vm74_vm0, %v68_v0, 0.0  ;;  %v78_v3 = vsel %vm74_vm0, %v69_v1, 0.0  ;;  %v70_v4 = vld [vmem:[%s3666_s0 + $0x10] sm:$0xff]  ;;  %v71_v15 = vld [vmem:[%s3666_s0 + $0x18] sm:$0xff]  ;;  %v148_v18 = vld [vmem:[%s3671_s5] sm:$0xff]  ;;  %vm266_vm2 = vcmask 64512  }
  0x29   :  { %76 = vadd.xlane.f32.xlu0 %v75_v2  ;;  %v81_v5 = vsel %vm74_vm0, %v70_v4, 0.0  ;;  %v84_v17 = vsel %vm74_vm0, %v71_v15, 0.0  ;;  %v149_v19 = vld [vmem:[%s3671_s5 + $0x8] sm:$0xff]  ;;  %v150_v20 = vld [vmem:[%s3671_s5 + $0x10] sm:$0xff]  ;;  %v151_v22 = vld [vmem:[%s3671_s5 + $0x18] sm:$0xff]  ;;  %s3148_s30 = smov 120  }
  0x2a   :  { %v2759_v21 = vpack.c.bf16 %v149_v19, %v148_v18  ;;  %v2763_v23 = vpack.c.bf16 %v151_v22, %v150_v20  ;;  %v2412_v40 = vld [vmem:[%s3667_s1] ss:$0 sm:$0xff]  ;;  %s3146_s1 = smov 88   ;;  %s3149_s15 = smov 80   ;;  %vm3323_vm3 = vmpackc.low %vm266_vm2, %vm266_vm2  ;;  %vm350_vm5 = vcmask 130048   ;;  %vm674_vm6 = vcmask 130112  }
  0x2b   :  { %v2413_v43 = vld [vmem:[%s3668_s2] ss:$0 sm:$0xff]  ;;  %s3147_s2 = smov 96   ;;  %s3150_s16 = smov 112   ;;  %vm889_vm7 = vcmask 195712   ;;  %vm1104_vm8 = vcmask 261312  }
  0x2c   :  { %2760 = vmatprep.subr.bf16.mxu1 %v2759_v21  ;;  %s3152_s9 = smov 64   ;;  %s3153_s17 = smov 48   ;;  %vm2288_vm9 = vcmask 523264  }
  0x2d   :  { %79 = vadd.xlane.f32.xlu0 %v78_v3  ;;  %2762 = vmatpush3.bf16.msra.mxu1 %v2759_v21  ;;  %s3154_s18 = smov 72   ;;  %s3155_s19 = smov 56  }
  0x2e   :  { %2764 = vmatprep.subr.bf16.mxu1 %v2763_v23  ;;  %s3156_s20 = smov 104   ;;  %s3157_s21 = smov 40  }
  0x2f   :  { %s3158_s23 = smov 16   ;;  %s3159_s24 = smov 24  }
  0x31   :  { %82 = vadd.xlane.f32.xlu0 %v81_v5  ;;  %2766 = vmatpush3.bf16.msra.mxu1 %v2763_v23 }
  0xb6   :  { %v77_v6 = vpop.xlane.xlu0 %76 }
  0xb7   :  { %v88_v7 = vmul.f32 0.03125, %v77_v6 }
  0xb9   :  { %v92_v8 = vsub.f32 %v68_v0, %v88_v7 }
  0xba   :  { %v80_v9 = vpop.xlane.xlu0 %79 }
  0xbb   :  { %v89_v10 = vmul.f32 0.03125, %v80_v9  ;;  %v96_v11 = vmul.f32 %v92_v8, %v92_v8 }
  0xbd   :  { %v93_v12 = vsub.f32 %v69_v1, %v89_v10  ;;  %v100_v13 = vsel %vm74_vm0, %v96_v11, 0.0 }
  0xbe   :  { %101 = vadd.xlane.f32.xlu1 %v100_v13  ;;  %v83_v24 = vpop.xlane.xlu0 %82 }
  0xbf   :  { %v97_v14 = vmul.f32 %v93_v12, %v93_v12  ;;  %v90_v25 = vmul.f32 0.03125, %v83_v24  ;;  %v254_v24 = vlaneseq }
  0xc1   :  { %v103_v16 = vsel %vm74_vm0, %v97_v14, 0.0  ;;  %v94_v26 = vsub.f32 %v70_v4, %v90_v25  ;;  %v255_v25 = vand.u32 127, %v254_v24 }
  0xc2   :  { %104 = vadd.xlane.f32.xlu1 %v103_v16 }
  0xc3   :  { %v98_v27 = vmul.f32 %v94_v26, %v94_v26  ;;  %vm256_vm4 = vcmp.lt.s32.totalorder %v255_v25, 10 }
  0xc5   :  { %v106_v28 = vsel %vm74_vm0, %v98_v27, 0.0 }
  0xc6   :  { %85 = vadd.xlane.f32.xlu1 %v84_v17  ;;  %107 = vadd.xlane.f32.xlu0 %v106_v28 }
 0x14b   :  { %v102_v29 = vpop.xlane.xlu1 %101 }
 0x14c   :  { %v112_v30 = vmul.f32 0.03125, %v102_v29 }
 0x14e   :  { %v116_v31 = vadd.f32 1e-06, %v112_v30 }
 0x14f   :  { %v105_v32 = vpop.xlane.xlu1 %104 }
 0x150   :  { %2978 = vrsqrt.f32 %v116_v31  ;;  %v113_v33 = vmul.f32 0.03125, %v105_v32 }
 0x152   :  { %v117_v34 = vadd.f32 1e-06, %v113_v33 }
 0x153   :  { %v86_v35 = vpop.xlane.xlu1 %85  ;;  %v108_v50 = vpop.xlane.xlu0 %107 }
 0x154   :  { %2980 = vrsqrt.f32 %v117_v34  ;;  %v91_v36 = vmul.f32 0.03125, %v86_v35  ;;  %v114_v51 = vmul.f32 0.03125, %v108_v50 }
 0x156   :  { %v95_v37 = vsub.f32 %v71_v15, %v91_v36  ;;  %v118_v52 = vadd.f32 1e-06, %v114_v51 }
 0x158   :  { %v99_v38 = vmul.f32 %v95_v37, %v95_v37  ;;  %2982 = vrsqrt.f32 %v118_v52 }
 0x15a   :  { %v2979_v39 = vpop.eup %2978  ;;  %v109_v41 = vsel %vm74_vm0, %v99_v38, 0.0 }
 0x15b   :  { %v124_v42 = vmul.f32 %v2979_v39, %v92_v8  ;;  %110 = vadd.xlane.f32.xlu1 %v109_v41 }
 0x15d   :  { %v134_v44 = vmul.f32 %v2412_v40, %v124_v42 }
 0x15e   :  { %v2981_v45 = vpop.eup %2980 }
 0x15f   :  { %v144_v46 = vadd.f32 %v2413_v43, %v134_v44  ;;  %v125_v47 = vmul.f32 %v2981_v45, %v93_v12 }
 0x161   :  { %2591 = vmatprep.mubr.msk.f32.mxu1 %vm74_vm0, %v144_v46  ;;  %v135_v48 = vmul.f32 %v2412_v40, %v125_v47 }
 0x162   :  { %v2983_v53 = vpop.eup %2982 }
 0x163   :  { %v145_v49 = vadd.f32 %v2413_v43, %v135_v48  ;;  %v126_v54 = vmul.f32 %v2983_v53, %v94_v26  ;;  %v3151_v26 = vmov -1e+30  }
 0x164   :  { %v3347_v27 = vsel %vm256_vm4, 0.0, %v3151_v26 }
 0x165   :  { %2592 = vmatmul.mubr.msk.f32.vlgmr.msra.gmra.mrb[0].mxu1 %vm74_vm0, %v145_v49  ;;  %v136_v55 = vmul.f32 %v2412_v40, %v126_v54 }
 0x167   :  { %v146_v56 = vadd.f32 %v2413_v43, %v136_v55 }
 0x169   :  { %2594 = vmatprep.mubr.msk.f32.mxu1 %vm74_vm0, %v146_v56 }
 0x1e8   :  { %v111_v57 = vpop.xlane.xlu1 %110 }
 0x1e9   :  { %v115_v58 = vmul.f32 0.03125, %v111_v57 }
 0x1eb   :  { %v119_v59 = vadd.f32 1e-06, %v115_v58 }
 0x1ed   :  { %2984 = vrsqrt.f32 %v119_v59 }
 0x1f7   :  { %v2985_v60 = vpop.eup %2984 }
 0x1f8   :  { %v127_v61 = vmul.f32 %v2985_v60, %v95_v37 }
 0x1fa   :  { %v137_v62 = vmul.f32 %v2412_v40, %v127_v61 }
 0x1fc   :  { %v147_v63 = vadd.f32 %v2413_v43, %v137_v62 }
 0x1fe   :  { %2595 = vmatmul.mubr.msk.f32.gmra.mrb[2].mxu1 %vm74_vm0, %v147_v63 }
 0x238   :  { %v2593_v0 = vpop.f32.mrb[0].mxu1 }
 0x239   :  { %251 = vst.msk [vmem:[#allocation2 + $0x8] sm:$0xff] %vm249_vm1, %v2593_v0  ;;  %v230_v1 = vpop.f32.mrb[1].mxu1 }
 0x23a   :  { %250 = vst.msk [vmem:[#allocation2] sm:$0xff] %vm249_vm1, %v230_v1 }
 0x240   :  { %v3297_v2 = vld [vmem:[#allocation2 + $0x8] sm:$0xff] }
 0x241   :  { %v3299_v3 = vld [vmem:[#allocation2] sm:$0xff] }
 0x242   :  { %2601 = vmatprep.mubr.msk.f32.mxu1 %vm266_vm2, %v3299_v3  ;;  %v3305_v4 = vpack.i.bf16 %v3297_v2, %v3299_v3 }
 0x244   :  { %2904 = vrot.lane.b32.xlu1 %v3305_v4, %s3146_s1  ;;  %2899 = vrot.lane.b32.xlu0 %v3305_v4, %s3147_s2 }
 0x248   :  { %466 = vrot.lane.b32.xlu1 %v3299_v3, %s3148_s30  ;;  %468 = vrot.lane.b32.xlu0 %v3297_v2, %s3148_s30 }
 0x24c   :  { %2909 = vrot.lane.b32.xlu1 %v3305_v4, %s3149_s15  ;;  %683 = vrot.lane.b32.xlu0 %v3297_v2, %s3150_s16 }
 0x250   :  { %681 = vrot.lane.b32.xlu1 %v3299_v3, %s3150_s16 }
 0x2b6   :  { %v2905_v5 = vpop.permute.xlu1 %2904  ;;  %v2900_v6 = vpop.permute.xlu0 %2899 }
 0x2b7   :  { %v2907_v7 = vunpack.i.h.bf16 %v2905_v5  ;;  %v2906_v8 = vunpack.i.l.bf16 %v2905_v5  ;;  %v2902_v9 = vunpack.i.h.bf16 %v2900_v6  ;;  %v2901_v10 = vunpack.i.l.bf16 %v2900_v6 }
 0x2b9   :  { %v2767_v12 = vpack.c.bf16 %v2902_v9, %v2901_v10  ;;  %v2777_v13 = vpack.c.bf16 %v2907_v7, %v2906_v8 }
 0x2ba   :  { %v467_v14 = vpop.permute.xlu1 %466  ;;  %v469_v20 = vpop.permute.xlu0 %468 }
 0x2bb   :  { %2769 = vmatprep.subr.msk.bf16.mxu1 %vm3323_vm3, %v2767_v12  ;;  %2779 = vmatprep.subr.msk.bf16.mxu0 %vm3323_vm3, %v2777_v13 }
 0x2bc   :  { %2615 = vmatprep.mubr.msk.f32.mxu0 %vm266_vm2, %v467_v14  ;;  %2772 = vmatpush3.bf16.xpose.msk.msra.mxu1 %vm3323_vm3, %v2767_v12 }
 0x2bd   :  { %2782 = vmatpush3.bf16.xpose.msk.msra.mxu0 %vm3323_vm3, %v2777_v13 }
 0x2be   :  { %v2910_v15 = vpop.permute.xlu1 %2909  ;;  %v684_v21 = vpop.permute.xlu0 %683 }
 0x2bf   :  { %v2912_v16 = vunpack.i.h.bf16 %v2910_v15  ;;  %v2911_v17 = vunpack.i.l.bf16 %v2910_v15 }
 0x2c1   :  { %v2787_v18 = vpack.c.bf16 %v2912_v16, %v2911_v17 }
 0x2c2   :  { %v682_v19 = vpop.permute.xlu1 %681 }
 0x2c3   :  { %2602 = vmatmul.mubr.msk.f32.vlgmr.msra.gmra.mrb[4].mxu1 %vm266_vm2, %v3297_v2  ;;  %2789 = vmatprep.subr.msk.bf16.mxu0 %vm3323_vm3, %v2787_v18 }
 0x2c4   :  { %2616 = vmatmul.mubr.msk.f32.vlgmr.msra.gmra.mrb[0].mxu0 %vm266_vm2, %v469_v20 }
 0x2c5   :  { %2792 = vmatpush3.bf16.xpose.msk.msra.mxu0 %vm3323_vm3, %v2787_v18  ;;  %2629 = vmatprep.mubr.msk.f32.mxu0 %vm266_vm2, %v682_v19 }
 0x2cc   :  { %2630 = vmatmul.mubr.msk.f32.vlgmr.msra.gmra.mrb[2].mxu0 %vm266_vm2, %v684_v21 }
 0x2d1   :  { %v2596_v22 = vpop.f32.mrb[2].mxu1 }
 0x2d2   :  { %253 = vst.msk [vmem:[#allocation2 + $0x18] sm:$0xff] %vm249_vm1, %v2596_v22  ;;  %v240_v23 = vpop.f32.mrb[3].mxu1 }
 0x2d3   :  { %252 = vst.msk [vmem:[#allocation2 + $0x10] sm:$0xff] %vm249_vm1, %v240_v23 }
 0x396   :  { %v2603_v28 = vpop.f32.mrb[4].mxu1 }
 0x397   :  { %v347_v29 = vadd.f32 %v2603_v28, %v3347_v27  ;;  %v2617_v30 = vpop.f32.mrb[0].mxu0  ;;  %v341_v31 = vpop.f32.mrb[5].mxu1 }
 0x398   :  { %v342_v32 = vadd.f32 %v341_v31, %v3347_v27  ;;  %v548_v33 = vpop.f32.mrb[1].mxu0  ;;  %v554_v37 = vadd.f32 %v2617_v30, %v3347_v27 }
 0x399   :  { %v549_v34 = vadd.f32 %v548_v33, %v3347_v27  ;;  %v354_v35 = vsel %vm350_vm5, %v347_v29, -inf }
 0x39a   :  { %355 = vmax.xlane.f32.xlu0 %v354_v35  ;;  %v351_v36 = vsel %vm350_vm5, %v342_v32, -inf  ;;  %v560_v43 = vsel %vm350_vm5, %v554_v37, -inf }
 0x39b   :  { %352 = vmax.xlane.f32.xlu1 %v351_v36  ;;  %v557_v38 = vsel %vm350_vm5, %v549_v34, -inf }
 0x39e   :  { %558 = vmax.xlane.f32.xlu0 %v557_v38 }
 0x39f   :  { %v2631_v39 = vpop.f32.mrb[2].mxu0 }
 0x3a0   :  { %v763_v40 = vpop.f32.mrb[3].mxu0  ;;  %v769_v41 = vadd.f32 %v2631_v39, %v3347_v27 }
 0x3a1   :  { %v764_v42 = vadd.f32 %v763_v40, %v3347_v27 }
 0x3a2   :  { %561 = vmax.xlane.f32.xlu0 %v560_v43  ;;  %v775_v45 = vsel %vm350_vm5, %v769_v41, -inf }
 0x3a3   :  { %v772_v44 = vsel %vm350_vm5, %v764_v42, -inf }
 0x3a4   :  { %773 = vmax.xlane.f32.xlu1 %v772_v44 }
 0x3a6   :  { %776 = vmax.xlane.f32.xlu0 %v775_v45 }
 0x3b5   :  { %2914 = vrot.lane.b32.xlu1 %v3305_v4, %s3152_s9 }
 0x427   :  { %v356_v46 = vpop.xlane.xlu0 %355 }
 0x428   :  { %v358_v47 = vsub.f32 %v347_v29, %v356_v46  ;;  %v353_v48 = vpop.xlane.xlu1 %352 }
 0x429   :  { %v357_v49 = vsub.f32 %v342_v32, %v353_v48 }
 0x42a   :  { %v361_v50 = vmul.f32 1.442695, %v358_v47 }
 0x42b   :  { %v359_v51 = vmul.f32 1.442695, %v357_v49  ;;  %v559_v52 = vpop.xlane.xlu0 %558 }
 0x42c   :  { %2986 = vpow2.f32 %v361_v50  ;;  %v563_v53 = vsub.f32 %v549_v34, %v559_v52 }
 0x42d   :  { %2988 = vpow2.f32 %v359_v51 }
 0x42e   :  { %v565_v54 = vmul.f32 1.442695, %v563_v53 }
 0x42f   :  { %v562_v55 = vpop.xlane.xlu0 %561 }
 0x430   :  { %2990 = vpow2.f32 %v565_v54  ;;  %v564_v56 = vsub.f32 %v554_v37, %v562_v55 }
 0x431   :  { %v774_v57 = vpop.xlane.xlu1 %773 }
 0x432   :  { %v567_v58 = vmul.f32 1.442695, %v564_v56  ;;  %v778_v16 = vsub.f32 %v764_v42, %v774_v57 }
 0x433   :  { %v777_v59 = vpop.xlane.xlu0 %776 }
 0x434   :  { %2992 = vpow2.f32 %v567_v58  ;;  %v779_v60 = vsub.f32 %v769_v41, %v777_v59  ;;  %v780_v17 = vmul.f32 1.442695, %v778_v16  ;;  %v3409_v16 = vld [vmem:[#allocation2 + $0x10] sm:$0xff] }
 0x435   :  { %v2915_v61 = vpop.permute.xlu1 %2914 }
 0x436   :  { %v2987_v62 = vpop.eup %2986  ;;  %v782_v63 = vmul.f32 1.442695, %v779_v60  ;;  %v2917_v0 = vunpack.i.h.bf16 %v2915_v61  ;;  %v2916_v1 = vunpack.i.l.bf16 %v2915_v61 }
 0x437   :  { %v2989_v5 = vpop.eup %2988  ;;  %v366_v6 = vsel %vm350_vm5, %v2987_v62, 0.0 }
 0x438   :  { %2994 = vpow2.f32 %v782_v63  ;;  %v2773_v7 = vpack.c.bf16 %v2917_v0, %v2916_v1  ;;  %367 = vadd.xlane.f32.xlu0 %v366_v6  ;;  %v363_v8 = vsel %vm350_vm5, %v2989_v5, 0.0 }
 0x439   :  { %364 = vadd.xlane.f32.xlu1 %v363_v8  ;;  %2996 = vpow2.f32 %v780_v17  ;;  %v3411_v17 = vld [vmem:[#allocation2 + $0x18] sm:$0xff] }
 0x43a   :  { %v2991_v9 = vpop.eup %2990  ;;  %2774 = vmatprep.subr.bf16.mxu1 %v2773_v7 }
 0x43b   :  { %2776 = vmatpush3.bf16.msra.mxu1 %v2773_v7  ;;  %v569_v10 = vsel %vm350_vm5, %v2991_v9, 0.0 }
 0x43d   :  { %570 = vadd.xlane.f32.xlu1 %v569_v10 }
 0x43e   :  { %v2993_v12 = vpop.eup %2992 }
 0x43f   :  { %v572_v13 = vsel %vm350_vm5, %v2993_v12, 0.0 }
 0x440   :  { %573 = vadd.xlane.f32.xlu0 %v572_v13 }
 0x442   :  { %v2995_v14 = vpop.eup %2994 }
 0x443   :  { %v787_v15 = vsel %vm350_vm5, %v2995_v14, 0.0  ;;  %v2997_v18 = vpop.eup %2996 }
 0x444   :  { %788 = vadd.xlane.f32.xlu0 %v787_v15  ;;  %v784_v19 = vsel %vm350_vm5, %v2997_v18, 0.0 }
 0x44e   :  { %2924 = vrot.lane.b32.xlu1 %v3305_v4, %s3153_s17 }
 0x452   :  { %2929 = vrot.lane.b32.xlu1 %v3305_v4, %s3154_s18 }
 0x45a   :  { %2919 = vrot.lane.b32.xlu0 %v3305_v4, %s3155_s19 }
 0x45e   :  { %898 = vrot.lane.b32.xlu0 %v3297_v2, %s3156_s20 }
 0x476   :  { %785 = vadd.xlane.f32.xlu1 %v784_v19 }
 0x487   :  { %896 = vrot.lane.b32.xlu1 %v3299_v3, %s3156_s20 }
 0x4c5   :  { %v368_v20 = vpop.xlane.xlu0 %367 }
 0x4c6   :  { %2998 = vrcp.f32 %v368_v20  ;;  %v365_v21 = vpop.xlane.xlu1 %364 }
 0x4c7   :  { %3000 = vrcp.f32 %v365_v21 }
 0x4ca   :  { %v571_v22 = vpop.xlane.xlu1 %570 }
 0x4cb   :  { %3002 = vrcp.f32 %v571_v22 }
 0x4cd   :  { %v574_v23 = vpop.xlane.xlu0 %573 }
 0x4ce   :  { %3004 = vrcp.f32 %v574_v23  ;;  %v2925_v25 = vpop.permute.xlu1 %2924 }
 0x4cf   :  { %v2927_v31 = vunpack.i.h.bf16 %v2925_v25  ;;  %v2926_v3 = vunpack.i.l.bf16 %v2925_v25 }
 0x4d0   :  { %v2999_v24 = vpop.eup %2998 }
 0x4d1   :  { %v3001_v2 = vpop.eup %3000  ;;  %v789_v26 = vpop.xlane.xlu0 %788  ;;  %v372_v29 = vmul.f32 %v2999_v24, %v2987_v62  ;;  %v2793_v39 = vpack.c.bf16 %v2927_v31, %v2926_v3 }
 0x4d2   :  { %v371_v28 = vmul.f32 %v3001_v2, %v2989_v5  ;;  %v2930_v36 = vpop.permute.xlu1 %2929  ;;  %3006 = vrcp.f32 %v789_v26 }
 0x4d3   :  { %v2932_v40 = vunpack.i.h.bf16 %v2930_v36  ;;  %v2931_v41 = vunpack.i.l.bf16 %v2930_v36 }
 0x4d4   :  { %2608 = vmatprep.mubr.msk.f32.mxu1 %vm350_vm5, %v371_v28 }
 0x4d5   :  { %v3003_v30 = vpop.eup %3002  ;;  %v2920_v32 = vpop.permute.xlu0 %2919  ;;  %2609 = vmatmul.mubr.msk.f32.vlgmr.msra.gmra.mrb[6].mxu1 %vm350_vm5, %v372_v29  ;;  %v2797_v43 = vpack.c.bf16 %v2932_v40, %v2931_v41 }
 0x4d6   :  { %v2922_v33 = vunpack.i.h.bf16 %v2920_v32  ;;  %v2921_v34 = vunpack.i.l.bf16 %v2920_v32  ;;  %v577_v35 = vmul.f32 %v3003_v30, %v2991_v9 }
 0x4d8   :  { %v2783_v37 = vpack.c.bf16 %v2922_v33, %v2921_v34  ;;  %2622 = vmatprep.mubr.msk.f32.mxu1 %vm350_vm5, %v577_v35  ;;  %v3005_v38 = vpop.eup %3004 }
 0x4d9   :  { %v578_v42 = vmul.f32 %v3005_v38, %v2993_v12  ;;  %v899_v50 = vpop.permute.xlu0 %898 }
 0x4da   :  { %2784 = vmatprep.subr.bf16.mxu1 %v2783_v37 }
 0x4db   :  { %2786 = vmatpush3.bf16.msra.mxu1 %v2783_v37 }
 0x4dc   :  { %2794 = vmatprep.subr.bf16.mxu1 %v2793_v39  ;;  %v3007_v45 = vpop.eup %3006 }
 0x4dd   :  { %v793_v48 = vmul.f32 %v3007_v45, %v2995_v14 }
 0x4de   :  { %2623 = vmatmul.mubr.msk.f32.vlgmr.msra.gmra.mrb[8].mxu1 %vm350_vm5, %v578_v42 }
 0x4df   :  { %2796 = vmatpush3.bf16.msra.mxu1 %v2793_v39 }
 0x4e0   :  { %2799 = vmatprep.subr.msk.bf16.mxu1 %vm3323_vm3, %v2797_v43 }
 0x503   :  { %v786_v44 = vpop.xlane.xlu1 %785 }
 0x504   :  { %3008 = vrcp.f32 %v786_v44 }
 0x507   :  { %v897_v49 = vpop.permute.xlu1 %896 }
 0x50e   :  { %v3009_v46 = vpop.eup %3008 }
 0x50f   :  { %v792_v47 = vmul.f32 %v3009_v46, %v2997_v18  ;;  %v3415_v18 = vpack.i.bf16 %v3411_v17, %v3409_v16 }
 0x511   :  { %2636 = vmatprep.mubr.msk.f32.mxu1 %vm350_vm5, %v792_v47 }
 0x512   :  { %2637 = vmatmul.mubr.msk.f32.vlgmr.msra.gmra.mrb[10].mxu1 %vm350_vm5, %v793_v48 }
 0x513   :  { %2802 = vmatpush3.bf16.xpose.msk.msra.mxu1 %vm3323_vm3, %v2797_v43  ;;  %2643 = vmatprep.mubr.msk.f32.mxu1 %vm266_vm2, %v897_v49 }
 0x51a   :  { %2644 = vmatmul.mubr.msk.f32.vlgmr.msra.gmra.mrb[12].mxu1 %vm266_vm2, %v899_v50 }
 0x5a8   :  { %v2610_v51 = vpop.f32.mrb[6].mxu1 }
 0x5a9   :  { %461 = vst.msk [vmem:[#allocation3 + $0x8] sm:$0xff] %vm266_vm2, %v2610_v51  ;;  %v451_v52 = vpop.f32.mrb[7].mxu1 }
 0x5aa   :  { %460 = vst.msk [vmem:[#allocation3] sm:$0xff] %vm266_vm2, %v451_v52 }
 0x5b1   :  { %v3393_v53 = vpop.f32.mrb[8].mxu1 }
 0x5b2   :  { %v3395_v54 = vpop.f32.mrb[9].mxu1 }
 0x5e5   :  { %v3397_v55 = vpop.f32.mrb[10].mxu1 }
 0x5e6   :  { %v3399_v56 = vpop.f32.mrb[11].mxu1 }
 0x5ed   :  { %v2645_v57 = vpop.f32.mrb[12].mxu1 }
 0x5ee   :  { %v984_v58 = vadd.f32 %v2645_v57, %v3347_v27  ;;  %v978_v59 = vpop.f32.mrb[13].mxu1 }
 0x5ef   :  { %v979_v60 = vadd.f32 %v978_v59, %v3347_v27 }
 0x5f0   :  { %v990_v61 = vsel %vm350_vm5, %v984_v58, -inf }
 0x5f1   :  { %991 = vmax.xlane.f32.xlu0 %v990_v61  ;;  %v987_v62 = vsel %vm350_vm5, %v979_v60, -inf }
 0x5f2   :  { %988 = vmax.xlane.f32.xlu1 %v987_v62 }
 0x603   :  { %2934 = vrot.lane.b32.xlu1 %v3305_v4, %s3157_s21 }
 0x67e   :  { %v992_v63 = vpop.xlane.xlu0 %991 }
 0x67f   :  { %v994_v0 = vsub.f32 %v984_v58, %v992_v63  ;;  %v989_v1 = vpop.xlane.xlu1 %988 }
 0x680   :  { %v993_v5 = vsub.f32 %v979_v60, %v989_v1 }
 0x681   :  { %v997_v6 = vmul.f32 1.442695, %v994_v0 }
 0x682   :  { %v995_v7 = vmul.f32 1.442695, %v993_v5 }
 0x683   :  { %3010 = vpow2.f32 %v997_v6  ;;  %v2935_v8 = vpop.permute.xlu1 %2934 }
 0x684   :  { %v2937_v9 = vunpack.i.h.bf16 %v2935_v8  ;;  %v2936_v10 = vunpack.i.l.bf16 %v2935_v8  ;;  %3012 = vpow2.f32 %v995_v7 }
 0x686   :  { %v2803_v12 = vpack.c.bf16 %v2937_v9, %v2936_v10 }
 0x688   :  { %2804 = vmatprep.subr.bf16.mxu0 %v2803_v12 }
 0x689   :  { %2806 = vmatpush3.bf16.msra.mxu0 %v2803_v12 }
 0x68d   :  { %v3011_v13 = vpop.eup %3010 }
 0x68e   :  { %v1002_v14 = vsel %vm350_vm5, %v3011_v13, 0.0  ;;  %v3013_v15 = vpop.eup %3012 }
 0x68f   :  { %1003 = vadd.xlane.f32.xlu0 %v1002_v14  ;;  %v999_v4 = vsel %vm350_vm5, %v3013_v15, 0.0 }
 0x693   :  { %1000 = vadd.xlane.f32.xlu0 %v999_v4 }
 0x6a9   :  { %2939 = vrot.lane.b32.xlu0 %v3415_v18, %s3147_s2 }
 0x71c   :  { %v1004_v19 = vpop.xlane.xlu0 %1003 }
 0x71d   :  { %3014 = vrcp.f32 %v1004_v19 }
 0x720   :  { %v1001_v20 = vpop.xlane.xlu0 %1000 }
 0x721   :  { %3016 = vrcp.f32 %v1001_v20 }
 0x724   :  { %v2940_v21 = vpop.permute.xlu0 %2939 }
 0x725   :  { %v2942_v22 = vunpack.i.h.bf16 %v2940_v21  ;;  %v2941_v23 = vunpack.i.l.bf16 %v2940_v21 }
 0x727   :  { %v2807_v24 = vpack.c.bf16 %v2942_v22, %v2941_v23  ;;  %v3015_v2 = vpop.eup %3014 }
 0x728   :  { %v1008_v28 = vmul.f32 %v3015_v2, %v3011_v13 }
 0x729   :  { %2809 = vmatprep.subr.msk.bf16.mxu0 %vm3323_vm3, %v2807_v24 }
 0x72b   :  { %v3017_v25 = vpop.eup %3016 }
 0x72c   :  { %v1007_v26 = vmul.f32 %v3017_v25, %v3013_v15 }
 0x72e   :  { %2650 = vmatprep.mubr.msk.f32.mxu0 %vm350_vm5, %v1007_v26 }
 0x72f   :  { %2651 = vmatmul.mubr.msk.f32.vlgmr.msra.gmra.mrb[4].mxu0 %vm350_vm5, %v1008_v28 }
 0x730   :  { %2812 = vmatpush3.bf16.xpose.msk.msra.mxu0 %vm3323_vm3, %v2807_v24  ;;  %2657 = vmatprep.mubr.msk.f32.mxu0 %vm266_vm2, %v3409_v16 }
 0x737   :  { %2658 = vmatmul.mubr.msk.f32.vlgmr.msra.gmra.mrb[6].mxu0 %vm266_vm2, %v3411_v17 }
 0x802   :  { %v3429_v29 = vpop.f32.mrb[4].mxu0 }
 0x803   :  { %v3431_v30 = vpop.f32.mrb[5].mxu0 }
 0x80a   :  { %v2659_v31 = vpop.f32.mrb[6].mxu0 }
 0x80b   :  { %v1195_v32 = vadd.f32 %v2659_v31, %v3347_v27  ;;  %v1189_v3 = vpop.f32.mrb[7].mxu0 }
 0x80c   :  { %v1190_v33 = vadd.f32 %v1189_v3, %v3347_v27 }
 0x80d   :  { %v1201_v34 = vsel %vm350_vm5, %v1195_v32, -inf }
 0x80e   :  { %1202 = vmax.xlane.f32.xlu0 %v1201_v34  ;;  %v1198_v35 = vsel %vm350_vm5, %v1190_v33, -inf }
 0x80f   :  { %1199 = vmax.xlane.f32.xlu1 %v1198_v35 }
 0x820   :  { %2944 = vrot.lane.b32.xlu1 %v3415_v18, %s3152_s9 }
 0x824   :  { %1313 = vrot.lane.b32.xlu1 %v3409_v16, %s3148_s30 }
 0x89b   :  { %v1203_v36 = vpop.xlane.xlu0 %1202 }
 0x89c   :  { %v1205_v37 = vsub.f32 %v1195_v32, %v1203_v36  ;;  %v1200_v38 = vpop.xlane.xlu1 %1199 }
 0x89d   :  { %v1204_v39 = vsub.f32 %v1190_v33, %v1200_v38 }
 0x89e   :  { %v1208_v40 = vmul.f32 1.442695, %v1205_v37 }
 0x89f   :  { %v1206_v41 = vmul.f32 1.442695, %v1204_v39 }
 0x8a0   :  { %3018 = vpow2.f32 %v1208_v40  ;;  %v2945_v42 = vpop.permute.xlu1 %2944 }
 0x8a1   :  { %3020 = vpow2.f32 %v1206_v41  ;;  %v2947_v43 = vunpack.i.h.bf16 %v2945_v42  ;;  %v2946_v44 = vunpack.i.l.bf16 %v2945_v42 }
 0x8a3   :  { %v2813_v45 = vpack.c.bf16 %v2947_v43, %v2946_v44 }
 0x8a4   :  { %v1314_v50 = vpop.permute.xlu1 %1313 }
 0x8a5   :  { %2814 = vmatprep.subr.bf16.mxu1 %v2813_v45 }
 0x8a6   :  { %2816 = vmatpush3.bf16.msra.mxu1 %v2813_v45 }
 0x8aa   :  { %v3019_v46 = vpop.eup %3018 }
 0x8ab   :  { %v3021_v47 = vpop.eup %3020  ;;  %v1213_v48 = vsel %vm350_vm5, %v3019_v46, 0.0 }
 0x8ac   :  { %1214 = vadd.xlane.f32.xlu0 %v1213_v48  ;;  %v1210_v49 = vsel %vm350_vm5, %v3021_v47, 0.0 }
 0x8ad   :  { %1211 = vadd.xlane.f32.xlu1 %v1210_v49 }
 0x8be   :  { %1315 = vrot.lane.b32.xlu1 %v3411_v17, %s3148_s30 }
 0x8c2   :  { %2949 = vrot.lane.b32.xlu0 %v3415_v18, %s3146_s1 }
 0x939   :  { %v1215_v51 = vpop.xlane.xlu0 %1214 }
 0x93a   :  { %3022 = vrcp.f32 %v1215_v51  ;;  %v1212_v52 = vpop.xlane.xlu1 %1211 }
 0x93b   :  { %3024 = vrcp.f32 %v1212_v52 }
 0x93d   :  { %v2950_v57 = vpop.permute.xlu0 %2949 }
 0x93e   :  { %v2952_v58 = vunpack.i.h.bf16 %v2950_v57  ;;  %v2951_v59 = vunpack.i.l.bf16 %v2950_v57  ;;  %v1316_v1 = vpop.permute.xlu1 %1315 }
 0x940   :  { %v2817_v60 = vpack.c.bf16 %v2952_v58, %v2951_v59 }
 0x942   :  { %2819 = vmatprep.subr.msk.bf16.mxu1 %vm3323_vm3, %v2817_v60 }
 0x944   :  { %v3023_v61 = vpop.eup %3022 }
 0x945   :  { %v3025_v62 = vpop.eup %3024  ;;  %v1219_v0 = vmul.f32 %v3023_v61, %v3019_v46 }
 0x946   :  { %v1218_v63 = vmul.f32 %v3025_v62, %v3021_v47 }
 0x948   :  { %2664 = vmatprep.mubr.msk.f32.mxu1 %vm350_vm5, %v1218_v63 }
 0x949   :  { %2665 = vmatmul.mubr.msk.f32.vlgmr.msra.gmra.mrb[14].mxu1 %vm350_vm5, %v1219_v0 }
 0x94a   :  { %2822 = vmatpush3.bf16.xpose.msk.msra.mxu1 %vm3323_vm3, %v2817_v60  ;;  %2671 = vmatprep.mubr.msk.f32.mxu1 %vm266_vm2, %v1314_v50 }
 0x951   :  { %2672 = vmatmul.mubr.msk.f32.vlgmr.msra.gmra.mrb[16].mxu1 %vm266_vm2, %v1316_v1 }
 0xa1c   :  { %v2666_v5 = vpop.f32.mrb[14].mxu1 }
 0xa1d   :  { %1308 = vst.msk [vmem:[#allocation3 + $0x18] sm:$0xff] %vm266_vm2, %v2666_v5  ;;  %v1298_v6 = vpop.f32.mrb[15].mxu1 }
 0xa1e   :  { %1307 = vst.msk [vmem:[#allocation3 + $0x10] sm:$0xff] %vm266_vm2, %v1298_v6 }
 0xa24   :  { %v2673_v7 = vpop.f32.mrb[16].mxu1 }
 0xa25   :  { %v1401_v8 = vadd.f32 %v2673_v7, %v3347_v27  ;;  %v1395_v9 = vpop.f32.mrb[17].mxu1 }
 0xa26   :  { %v1396_v10 = vadd.f32 %v1395_v9, %v3347_v27 }
 0xa27   :  { %v1407_v12 = vsel %vm350_vm5, %v1401_v8, -inf }
 0xa28   :  { %1408 = vmax.xlane.f32.xlu0 %v1407_v12  ;;  %v1404_v13 = vsel %vm350_vm5, %v1396_v10, -inf }
 0xa29   :  { %1405 = vmax.xlane.f32.xlu1 %v1404_v13 }
 0xa3a   :  { %2954 = vrot.lane.b32.xlu1 %v3415_v18, %s3155_s19 }
 0xa3e   :  { %1527 = vrot.lane.b32.xlu1 %v3409_v16, %s3150_s16 }
 0xa42   :  { %1529 = vrot.lane.b32.xlu1 %v3411_v17, %s3150_s16  ;;  %s3160_s16 = smov [#allocation9]  }
 0xab5   :  { %v1409_v14 = vpop.xlane.xlu0 %1408 }
 0xab6   :  { %v1411_v15 = vsub.f32 %v1401_v8, %v1409_v14  ;;  %v1406_v4 = vpop.xlane.xlu1 %1405 }
 0xab7   :  { %v1410_v19 = vsub.f32 %v1396_v10, %v1406_v4 }
 0xab8   :  { %v1414_v20 = vmul.f32 1.442695, %v1411_v15 }
 0xab9   :  { %v1412_v21 = vmul.f32 1.442695, %v1410_v19 }
 0xaba   :  { %3026 = vpow2.f32 %v1414_v20  ;;  %v2955_v22 = vpop.permute.xlu1 %2954 }
 0xabb   :  { %v2957_v23 = vunpack.i.h.bf16 %v2955_v22  ;;  %v2956_v24 = vunpack.i.l.bf16 %v2955_v22  ;;  %3028 = vpow2.f32 %v1412_v21 }
 0xabd   :  { %v2823_v2 = vpack.c.bf16 %v2957_v23, %v2956_v24 }
 0xabe   :  { %v1528_v41 = vpop.permute.xlu1 %1527 }
 0xabf   :  { %2824 = vmatprep.subr.bf16.mxu0 %v2823_v2 }
 0xac0   :  { %2826 = vmatpush3.bf16.msra.mxu0 %v2823_v2 }
 0xac2   :  { %v1530_v42 = vpop.permute.xlu1 %1529 }
 0xac4   :  { %v3027_v25 = vpop.eup %3026 }
 0xac5   :  { %v1419_v26 = vsel %vm350_vm5, %v3027_v25, 0.0  ;;  %v3029_v28 = vpop.eup %3028 }
 0xac6   :  { %1420 = vadd.xlane.f32.xlu0 %v1419_v26  ;;  %v1416_v31 = vsel %vm350_vm5, %v3029_v28, 0.0 }
 0xaca   :  { %1417 = vadd.xlane.f32.xlu0 %v1416_v31 }
 0xae0   :  { %2959 = vrot.lane.b32.xlu0 %v3415_v18, %s3149_s15 }
 0xb53   :  { %v1421_v32 = vpop.xlane.xlu0 %1420 }
 0xb54   :  { %3030 = vrcp.f32 %v1421_v32 }
 0xb57   :  { %v1418_v3 = vpop.xlane.xlu0 %1417 }
 0xb58   :  { %3032 = vrcp.f32 %v1418_v3 }
 0xb5b   :  { %v2960_v33 = vpop.permute.xlu0 %2959 }
 0xb5c   :  { %v2962_v34 = vunpack.i.h.bf16 %v2960_v33  ;;  %v2961_v35 = vunpack.i.l.bf16 %v2960_v33 }
 0xb5e   :  { %v2827_v36 = vpack.c.bf16 %v2962_v34, %v2961_v35  ;;  %v3031_v37 = vpop.eup %3030 }
 0xb5f   :  { %v1425_v40 = vmul.f32 %v3031_v37, %v3027_v25 }
 0xb60   :  { %2829 = vmatprep.subr.msk.bf16.mxu0 %vm3323_vm3, %v2827_v36 }
 0xb62   :  { %v3033_v38 = vpop.eup %3032 }
 0xb63   :  { %v1424_v39 = vmul.f32 %v3033_v38, %v3029_v28 }
 0xb65   :  { %2678 = vmatprep.mubr.msk.f32.mxu0 %vm350_vm5, %v1424_v39 }
 0xb66   :  { %2679 = vmatmul.mubr.msk.f32.vlgmr.msra.gmra.mrb[8].mxu0 %vm350_vm5, %v1425_v40 }
 0xb67   :  { %2832 = vmatpush3.bf16.xpose.msk.msra.mxu0 %vm3323_vm3, %v2827_v36  ;;  %2685 = vmatprep.mubr.msk.f32.mxu0 %vm266_vm2, %v1528_v41 }
 0xb6e   :  { %2686 = vmatmul.mubr.msk.f32.vlgmr.msra.gmra.mrb[10].mxu0 %vm266_vm2, %v1530_v42 }
 0xc39   :  { %v3479_v43 = vpop.f32.mrb[8].mxu0 }
 0xc3a   :  { %v3481_v44 = vpop.f32.mrb[9].mxu0 }
 0xc41   :  { %v2687_v45 = vpop.f32.mrb[10].mxu0 }
 0xc42   :  { %v1615_v46 = vadd.f32 %v2687_v45, %v3347_v27  ;;  %v1609_v47 = vpop.f32.mrb[11].mxu0  ;;  %v1956_v45 = vld [vmem:[%s3672_s6 + $0x8] sm:$0xff] }
 0xc43   :  { %v1610_v48 = vadd.f32 %v1609_v47, %v3347_v27 }
 0xc44   :  { %v1621_v49 = vsel %vm350_vm5, %v1615_v46, -inf }
 0xc45   :  { %1622 = vmax.xlane.f32.xlu0 %v1621_v49  ;;  %v1618_v50 = vsel %vm350_vm5, %v1610_v48, -inf }
 0xc46   :  { %1619 = vmax.xlane.f32.xlu1 %v1618_v50 }
 0xc57   :  { %2964 = vrot.lane.b32.xlu1 %v3415_v18, %s3153_s17 }
 0xc5b   :  { %1741 = vrot.lane.b32.xlu1 %v3409_v16, %s3156_s20 }
 0xc5f   :  { %1743 = vrot.lane.b32.xlu1 %v3411_v17, %s3156_s20 }
 0xcd2   :  { %v1623_v51 = vpop.xlane.xlu0 %1622 }
 0xcd3   :  { %v1625_v52 = vsub.f32 %v1615_v46, %v1623_v51  ;;  %v1620_v57 = vpop.xlane.xlu1 %1619 }
 0xcd4   :  { %v1624_v58 = vsub.f32 %v1610_v48, %v1620_v57 }
 0xcd5   :  { %v1628_v59 = vmul.f32 1.442695, %v1625_v52 }
 0xcd6   :  { %v1626_v60 = vmul.f32 1.442695, %v1624_v58 }
 0xcd7   :  { %3034 = vpow2.f32 %v1628_v59  ;;  %v2965_v61 = vpop.permute.xlu1 %2964 }
 0xcd8   :  { %v2967_v62 = vunpack.i.h.bf16 %v2965_v61  ;;  %v2966_v63 = vunpack.i.l.bf16 %v2965_v61  ;;  %3036 = vpow2.f32 %v1626_v60 }
 0xcda   :  { %v2833_v0 = vpack.c.bf16 %v2967_v62, %v2966_v63 }
 0xcdb   :  { %v1742_v19 = vpop.permute.xlu1 %1741 }
 0xcdc   :  { %2834 = vmatprep.subr.bf16.mxu1 %v2833_v0 }
 0xcdd   :  { %2836 = vmatpush3.bf16.msra.mxu1 %v2833_v0 }
 0xcdf   :  { %v1744_v20 = vpop.permute.xlu1 %1743 }
 0xce1   :  { %v3035_v1 = vpop.eup %3034 }
 0xce2   :  { %v1633_v16 = vsel %vm350_vm5, %v3035_v1, 0.0  ;;  %v3037_v5 = vpop.eup %3036 }
 0xce3   :  { %1634 = vadd.xlane.f32.xlu0 %v1633_v16  ;;  %v1630_v17 = vsel %vm350_vm5, %v3037_v5, 0.0 }
 0xce7   :  { %1631 = vadd.xlane.f32.xlu0 %v1630_v17 }
 0xcfd   :  { %2969 = vrot.lane.b32.xlu0 %v3415_v18, %s3154_s18 }
 0xd70   :  { %v1635_v6 = vpop.xlane.xlu0 %1634 }
 0xd71   :  { %3038 = vrcp.f32 %v1635_v6  ;;  %v2470_v6 = vld [vmem:[%s3673_s7] ss:$0 sm:$0xff]  ;;  %s2399_s7 = sshll.u32 %s3160_s16, 4  ;;  %s2400_s7 = int_to_ptr.vmem [resolvable:$true] %s2399_s7 }
 0xd72   :  { %p3119_p3 = scmp.lt.s32.totalorder %s2400_s7, %s2400_s7 }
 0xd74   :  { %v1632_v7 = vpop.xlane.xlu0 %1631 }
 0xd75   :  { %3040 = vrcp.f32 %v1632_v7  ;;  %v3067_v7 = vld [vmem:[%s3666_s0 + $0x8] sm:$0xff] }
 0xd78   :  { %v2970_v8 = vpop.permute.xlu0 %2969 }
 0xd79   :  { %v2972_v9 = vunpack.i.h.bf16 %v2970_v8  ;;  %v2971_v10 = vunpack.i.l.bf16 %v2970_v8 }
 0xd7b   :  { %v2837_v12 = vpack.c.bf16 %v2972_v9, %v2971_v10  ;;  %v3039_v13 = vpop.eup %3038 }
 0xd7c   :  { %v1639_v4 = vmul.f32 %v3039_v13, %v3035_v1 }
 0xd7d   :  { %2839 = vmatprep.subr.msk.bf16.mxu1 %vm3323_vm3, %v2837_v12 }
 0xd7f   :  { %v3041_v14 = vpop.eup %3040 }
 0xd80   :  { %v1638_v15 = vmul.f32 %v3041_v14, %v3037_v5  ;;  %v3066_v5 = vld [vmem:[%s3666_s0] sm:$0xff] }
 0xd82   :  { %2692 = vmatprep.mubr.msk.f32.mxu1 %vm350_vm5, %v1638_v15 }
 0xd83   :  { %2693 = vmatmul.mubr.msk.f32.vlgmr.msra.gmra.mrb[18].mxu1 %vm350_vm5, %v1639_v4 }
 0xd84   :  { %2842 = vmatpush3.bf16.xpose.msk.msra.mxu1 %vm3323_vm3, %v2837_v12  ;;  %2699 = vmatprep.mubr.msk.f32.mxu1 %vm266_vm2, %v1742_v19 }
 0xd8b   :  { %2700 = vmatmul.mubr.msk.f32.vlgmr.msra.gmra.mrb[20].mxu1 %vm266_vm2, %v1744_v20 }
 0xe56   :  { %v2694_v21 = vpop.f32.mrb[18].mxu1 }
 0xe57   :  { %v1718_v22 = vpop.f32.mrb[19].mxu1 }
 0xe5e   :  { %v2701_v23 = vpop.f32.mrb[20].mxu1 }
 0xe5f   :  { %v1829_v24 = vadd.f32 %v2701_v23, %v3347_v27  ;;  %v1823_v2 = vpop.f32.mrb[21].mxu1 }
 0xe60   :  { %v1824_v25 = vadd.f32 %v1823_v2, %v3347_v27 }
 0xe61   :  { %v1835_v26 = vsel %vm350_vm5, %v1829_v24, -inf }
 0xe62   :  { %1836 = vmax.xlane.f32.xlu0 %v1835_v26  ;;  %v1832_v28 = vsel %vm350_vm5, %v1824_v25, -inf }
 0xe63   :  { %1833 = vmax.xlane.f32.xlu1 %v1832_v28 }
 0xe74   :  { %2974 = vrot.lane.b32.xlu1 %v3415_v18, %s3157_s21 }
 0xe78   :  { %670 = vrot.lane.b32.xlu1 %v3393_v53, %s3144_s14 }
 0xe7c   :  { %883 = vrot.lane.b32.xlu1 %v3399_v56, %s3158_s23 }
 0xe80   :  { %885 = vrot.lane.b32.xlu1 %v3397_v55, %s3158_s23 }
 0xe84   :  { %1100 = vrot.lane.b32.xlu1 %v3429_v29, %s3159_s24 }
 0xe88   :  { %1517 = vrot.lane.b32.xlu1 %v3479_v43, %s3144_s14  ;;  %v1955_v43 = vld [vmem:[%s3672_s6] sm:$0xff] }
 0xe89   :  { %v2847_v46 = vpack.c.bf16 %v1956_v45, %v1955_v43 }
 0xe8c   :  { %1731 = vrot.lane.b32.xlu1 %v2694_v21, %s3158_s23 }
 0xeef   :  { %v1837_v11 = vpop.xlane.xlu0 %1836 }
 0xef0   :  { %v1839_v27 = vsub.f32 %v1829_v24, %v1837_v11  ;;  %v1834_v18 = vpop.xlane.xlu1 %1833  ;;  %v3068_v11 = vld [vmem:[%s3666_s0 + $0x18] sm:$0xff] }
 0xef1   :  { %v1838_v53 = vsub.f32 %v1824_v25, %v1834_v18  ;;  %v3069_v18 = vld [vmem:[%s3666_s0 + $0x10] sm:$0xff] }
 0xef2   :  { %v1842_v31 = vmul.f32 1.442695, %v1839_v27 }
 0xef3   :  { %v1840_v32 = vmul.f32 1.442695, %v1838_v53 }
 0xef4   :  { %v2975_v3 = vpop.permute.xlu1 %2974 }
 0xef5   :  { %3042 = vpow2.f32 %v1840_v32  ;;  %v2977_v56 = vunpack.i.h.bf16 %v2975_v3  ;;  %v2976_v33 = vunpack.i.l.bf16 %v2975_v3 }
 0xef6   :  { %3044 = vpow2.f32 %v1842_v31 }
 0xef7   :  { %v2843_v55 = vpack.c.bf16 %v2977_v56, %v2976_v33 }
 0xef8   :  { %v671_v34 = vpop.permute.xlu1 %670 }
 0xef9   :  { %676 = vst.msk [vmem:[#allocation3 + $0x8] sm:$0xff] %vm674_vm6, %v671_v34  ;;  %2844 = vmatprep.subr.bf16.mxu0 %v2843_v55 }
 0xefa   :  { %2846 = vmatpush3.bf16.msra.mxu0 %v2843_v55 }
 0xefb   :  { %2848 = vmatprep.subr.bf16.mxu0 %v2847_v46 }
 0xefc   :  { %v884_v29 = vpop.permute.xlu1 %883 }
 0xeff   :  { %v3043_v35 = vpop.eup %3042 }
 0xf00   :  { %v886_v36 = vpop.permute.xlu1 %885  ;;  %v1844_v37 = vsel %vm350_vm5, %v3043_v35, 0.0  ;;  %v3045_v38 = vpop.eup %3044 }
 0xf01   :  { %891 = vst.msk [vmem:[#allocation3 + $0x8] sm:$0xff] %vm889_vm7, %v886_v36  ;;  %1845 = vadd.xlane.f32.xlu0 %v1844_v37  ;;  %v1847_v40 = vsel %vm350_vm5, %v3045_v38, 0.0  ;;  %v2147_v36 = vld [vmem:[#allocation4 + $0x10] sm:$0xff] }
 0xf04   :  { %v1101_v39 = vpop.permute.xlu1 %1100 }
 0xf05   :  { %1106 = vst.msk [vmem:[#allocation3 + $0x8] sm:$0xff] %vm1104_vm8, %v1101_v39  ;;  %1848 = vadd.xlane.f32.xlu0 %v1847_v40 }
 0xf08   :  { %v1518_v41 = vpop.permute.xlu1 %1517 }
 0xf09   :  { %1522 = vst.msk [vmem:[#allocation3 + $0x18] sm:$0xff] %vm674_vm6, %v1518_v41 }
 0xf0c   :  { %v1732_v42 = vpop.permute.xlu1 %1731  ;;  %v1952_v62 = vld [vmem:[#allocation3 + $0x8] sm:$0xff] }
 0xf0d   :  { %1736 = vst.msk [vmem:[#allocation3 + $0x18] sm:$0xff] %vm889_vm7, %v1732_v42 }
 0xf1b   :  { %668 = vrot.lane.b32.xlu0 %v3395_v54, %s3144_s14 }
 0xf1f   :  { %1098 = vrot.lane.b32.xlu0 %v3431_v30, %s3159_s24  ;;  %v1957_v30 = vld [vmem:[%s3672_s6 + $0x10] sm:$0xff] }
 0xf23   :  { %1515 = vrot.lane.b32.xlu0 %v3481_v44, %s3144_s14  ;;  %v1958_v44 = vld [vmem:[%s3672_s6 + $0x18] sm:$0xff] }
 0xf24   :  { %v2851_v59 = vpack.c.bf16 %v1958_v44, %v1957_v30 }
 0xf27   :  { %1729 = vrot.lane.b32.xlu0 %v1718_v22, %s3158_s23 }
 0xf8e   :  { %v1846_v47 = vpop.xlane.xlu0 %1845 }
 0xf8f   :  { %3046 = vrcp.f32 %v1846_v47 }
 0xf92   :  { %v1849_v54 = vpop.xlane.xlu0 %1848 }
 0xf93   :  { %3048 = vrcp.f32 %v1849_v54 }
 0xf96   :  { %v669_v48 = vpop.permute.xlu0 %668 }
 0xf97   :  { %675 = vst.msk [vmem:[#allocation3] sm:$0xff] %vm674_vm6, %v669_v48 }
 0xf98   :  { %890 = vst.msk [vmem:[#allocation3] sm:$0xff] %vm889_vm7, %v884_v29  ;;  %v2145_v29 = vld [vmem:[#allocation4] sm:$0xff] }
 0xf99   :  { %v3047_v49 = vpop.eup %3046 }
 0xf9a   :  { %v1099_v50 = vpop.permute.xlu0 %1098  ;;  %v1852_v51 = vmul.f32 %v3047_v49, %v3043_v35  ;;  %v2146_v35 = vld [vmem:[#allocation4 + $0x8] sm:$0xff] }
 0xf9b   :  { %1105 = vst.msk [vmem:[#allocation3] sm:$0xff] %vm1104_vm8, %v1099_v50  ;;  %v2855_v37 = vpack.c.bf16 %v2146_v35, %v2145_v29 }
 0xf9c   :  { %2706 = vmatprep.mubr.msk.f32.mxu0 %vm350_vm5, %v1852_v51 }
 0xf9d   :  { %v3049_v52 = vpop.eup %3048  ;;  %2856 = vmatprep.subr.bf16.mxu1 %v2855_v37 }
 0xf9e   :  { %v1853_v57 = vmul.f32 %v3049_v52, %v3045_v38  ;;  %v1516_v58 = vpop.permute.xlu0 %1515  ;;  %v2148_v38 = vld [vmem:[#allocation4 + $0x18] sm:$0xff]  ;;  %2858 = vmatpush3.bf16.msra.mxu1 %v2855_v37 }
 0xf9f   :  { %1521 = vst.msk [vmem:[#allocation3 + $0x10] sm:$0xff] %vm674_vm6, %v1516_v58  ;;  %v2859_v39 = vpack.c.bf16 %v2148_v38, %v2147_v36 }
 0xfa0   :  { %2707 = vmatmul.mubr.msk.f32.vlgmr.msra.gmra.mrb[12].mxu0 %vm350_vm5, %v1853_v57 }
 0xfa1   :  { %2850 = vmatpush3.bf16.msra.mxu0 %v2847_v46  ;;  %2860 = vmatprep.subr.bf16.mxu1 %v2859_v39 }
 0xfa2   :  { %v1730_v60 = vpop.permute.xlu0 %1729  ;;  %2852 = vmatprep.subr.bf16.mxu0 %v2851_v59  ;;  %v1951_v61 = vld [vmem:[#allocation3] sm:$0xff]  ;;  %2862 = vmatpush3.bf16.msra.mxu1 %v2859_v39 }
 0xfa3   :  { %1735 = vst.msk [vmem:[#allocation3 + $0x10] sm:$0xff] %vm889_vm7, %v1730_v60  ;;  %2717 = vmatprep.mubr.msk.f32.mxu0 %vm74_vm0, %v1951_v61  ;;  %v2471_v60 = vld [vmem:[%s3669_s3] ss:$0 sm:$0xff] }
 0xfa5   :  { %2854 = vmatpush3.bf16.msra.mxu0 %v2851_v59 }
 0xfa8   :  { %2718 = vmatmul.mubr.msk.f32.vlgmr.msra.gmra.mrb[14].mxu0 %vm74_vm0, %v1952_v62 }
0x1073   :  { %v2708_v63 = vpop.f32.mrb[12].mxu0 }
0x1074   :  { %1945 = vrot.lane.b32.xlu1 %v2708_v63, %s3159_s24  ;;  %v1932_v0 = vpop.f32.mrb[13].mxu0 }
0x1075   :  { %1943 = vrot.lane.b32.xlu0 %v1932_v0, %s3159_s24  ;;  %v2472_v0 = vld [vmem:[%s3670_s4] ss:$0 sm:$0xff] }
0x107b   :  { %v2719_v1 = vpop.f32.mrb[14].mxu0 }
0x107c   :  { %v2037_v16 = vpop.f32.mrb[15].mxu0  ;;  %v2057_v8 = vadd.f32 %v3067_v7, %v2719_v1 }
0x107d   :  { %v2056_v17 = vadd.f32 %v3066_v5, %v2037_v16 }
0x107e   :  { %v3570_v10 = vadd.f32 %v2470_v6, %v2057_v8  ;;  %v2275_v8 = vld [vmem:[%s3676_s10 + $0x10] sm:$0xff] }
0x107f   :  { %v3568_v9 = vadd.f32 %v2470_v6, %v2056_v17  ;;  %v2273_v17 = vld [vmem:[%s3676_s10] sm:$0xff] }
0x1080   :  { %v2076_v13 = vsel %vm74_vm0, %v3570_v10, 0.0 }
0x1081   :  { %v2073_v12 = vsel %vm74_vm0, %v3568_v9, 0.0 }
0x1094   :  { %2074 = vadd.xlane.f32.xlu0 %v2073_v12  ;;  %v2276_v12 = vld [vmem:[%s3676_s10 + $0x18] sm:$0xff] }
0x1098   :  { %2077 = vadd.xlane.f32.xlu1 %v2076_v13  ;;  %v2867_v13 = vpack.c.bf16 %v2276_v12, %v2275_v8 }
0x10e6   :  { %v1946_v14 = vpop.permute.xlu1 %1945 }
0x10e7   :  { %1950 = vst.msk [vmem:[#allocation3 + $0x18] sm:$0xff] %vm1104_vm8, %v1946_v14  ;;  %v1944_v15 = vpop.permute.xlu0 %1943  ;;  %v2277_v14 = vld [vmem:[%s3676_s10 + $0x20] sm:$0xff] }
0x10e8   :  { %1949 = vst.msk [vmem:[#allocation3 + $0x10] sm:$0xff] %vm1104_vm8, %v1944_v15  ;;  %v2278_v15 = vld [vmem:[%s3676_s10 + $0x28] sm:$0xff] }
0x10ee   :  { %v1954_v19 = vld [vmem:[#allocation3 + $0x18] sm:$0xff] }
0x10ef   :  { %v1953_v4 = vld [vmem:[#allocation3 + $0x10] sm:$0xff] }
0x10f0   :  { %2720 = vmatprep.mubr.msk.f32.mxu0 %vm74_vm0, %v1953_v4  ;;  %v2871_v4 = vpack.c.bf16 %v2278_v15, %v2277_v14 }
0x10f1   :  { %2721 = vmatmul.mubr.msk.f32.gmra.mrb[16].mxu0 %vm74_vm0, %v1954_v19  ;;  %v2279_v19 = vld [vmem:[%s3676_s10 + $0x30] sm:$0xff] }
0x1121   :  { %v2075_v2 = vpop.xlane.xlu0 %2074 }
0x1122   :  { %v2085_v28 = vmul.f32 0.03125, %v2075_v2 }
0x1124   :  { %v2089_v32 = vsub.f32 %v3568_v9, %v2085_v28 }
0x1125   :  { %v2078_v20 = vpop.xlane.xlu1 %2077 }
0x1126   :  { %v2086_v21 = vmul.f32 0.03125, %v2078_v20  ;;  %v2093_v55 = vmul.f32 %v2089_v32, %v2089_v32  ;;  %v2280_v20 = vld [vmem:[%s3676_s10 + $0x38] sm:$0xff] }
0x1128   :  { %v2090_v22 = vsub.f32 %v3570_v10, %v2086_v21  ;;  %v2097_v34 = vsel %vm74_vm0, %v2093_v55, 0.0  ;;  %v2875_v21 = vpack.c.bf16 %v2280_v20, %v2279_v19  ;;  %v2473_v55 = vld [vmem:[#allocation7] ss:$0 sm:$0xff] }
0x112a   :  { %v2094_v23 = vmul.f32 %v2090_v22, %v2090_v22 }
0x112c   :  { %v2100_v24 = vsel %vm74_vm0, %v2094_v23, 0.0 }
0x112d   :  { %2101 = vadd.xlane.f32.xlu1 %v2100_v24 }
0x11ba   :  { %v2102_v40 = vpop.xlane.xlu1 %2101 }
0x11bb   :  { %v2110_v41 = vmul.f32 0.03125, %v2102_v40 }
0x11bd   :  { %v2114_v46 = vadd.f32 1e-06, %v2110_v41 }
0x11bf   :  { %3050 = vrsqrt.f32 %v2114_v46 }
0x11c4   :  { %v2722_v25 = vpop.f32.mrb[16].mxu0 }
0x11c5   :  { %v2047_v26 = vpop.f32.mrb[17].mxu0  ;;  %v2059_v27 = vadd.f32 %v3068_v11, %v2722_v25 }
0x11c6   :  { %v2058_v53 = vadd.f32 %v3069_v18, %v2047_v26 }
0x11c7   :  { %v3591_v3 = vadd.f32 %v2470_v6, %v2059_v27 }
0x11c8   :  { %v3588_v31 = vadd.f32 %v2470_v6, %v2058_v53  ;;  %v2274_v6 = vld [vmem:[%s3676_s10 + $0x8] sm:$0xff] }
0x11c9   :  { %v2082_v33 = vsel %vm74_vm0, %v3591_v3, 0.0  ;;  %v3051_v58 = vpop.eup %3050  ;;  %v2863_v7 = vpack.c.bf16 %v2274_v6, %v2273_v17 }
0x11ca   :  { %v2079_v56 = vsel %vm74_vm0, %v3588_v31, 0.0  ;;  %v2122_v59 = vmul.f32 %v3051_v58, %v2090_v22 }
0x11cb   :  { %2080 = vadd.xlane.f32.xlu0 %v2079_v56  ;;  %2864 = vmatprep.subr.bf16.mxu0 %v2863_v7 }
0x11cc   :  { %v2132_v63 = vmul.f32 %v2471_v60, %v2122_v59  ;;  %2866 = vmatpush3.bf16.msra.mxu0 %v2863_v7 }
0x11cd   :  { %2868 = vmatprep.subr.bf16.mxu0 %v2867_v13 }
0x11ce   :  { %v2142_v5 = vadd.f32 %v2472_v0, %v2132_v63  ;;  %v2478_v63 = vld [vmem:[%s3677_s11] ss:$0 sm:$0xff]  ;;  %s3114_s11 = scalar_lea.vmem %s2400_s7, 512 }
0x11cf   :  { %2083 = vadd.xlane.f32.xlu0 %v2082_v33  ;;  %p3115_p2 = scmp.ne.s32.totalorder %s2400_s7, %s3114_s11  ;;  %p3120_p4 = scmp.lt.s32.totalorder %s3114_s11, %s3114_s11 }
0x11d0   :  { %2870 = vmatpush3.bf16.msra.mxu0 %v2867_v13 }
0x11d1   :  { %2872 = vmatprep.subr.bf16.mxu0 %v2871_v4  ;;  %p3121_p5 = por %p3120_p4, %p3119_p3 }
0x11d3   :  { %2098 = vadd.xlane.f32.xlu0 %v2097_v34  ;;  %p3122_p6 = pnand %p3121_p5, %p3115_p2 }
0x11d4   :  { %2874 = vmatpush3.bf16.msra.mxu0 %v2871_v4 }
0x11d5   :  { %2876 = vmatprep.subr.bf16.mxu0 %v2875_v21 }
0x11d8   :  { %2878 = vmatpush3.bf16.msra.mxu0 %v2875_v21 }
0x1258   :  { %v2081_v42 = vpop.xlane.xlu0 %2080 }
0x1259   :  { %v2087_v43 = vmul.f32 0.03125, %v2081_v42 }
0x125b   :  { %v2091_v45 = vsub.f32 %v3588_v31, %v2087_v43 }
0x125c   :  { %v2084_v47 = vpop.xlane.xlu0 %2083 }
0x125d   :  { %v2088_v54 = vmul.f32 0.03125, %v2084_v47  ;;  %v2095_v48 = vmul.f32 %v2091_v45, %v2091_v45 }
0x125f   :  { %v2092_v49 = vsub.f32 %v3591_v3, %v2088_v54  ;;  %v2103_v50 = vsel %vm74_vm0, %v2095_v48, 0.0 }
0x1260   :  { %2104 = vadd.xlane.f32.xlu0 %v2103_v50  ;;  %v2099_v51 = vpop.xlane.xlu0 %2098 }
0x1261   :  { %v2109_v30 = vmul.f32 0.03125, %v2099_v51  ;;  %v2096_v44 = vmul.f32 %v2092_v49, %v2092_v49 }
0x1263   :  { %v2113_v52 = vadd.f32 1e-06, %v2109_v30  ;;  %v2106_v57 = vsel %vm74_vm0, %v2096_v44, 0.0 }
0x1264   :  { %2107 = vadd.xlane.f32.xlu1 %v2106_v57 }
0x1265   :  { %3052 = vrsqrt.f32 %v2113_v52 }
0x126f   :  { %v3053_v61 = vpop.eup %3052 }
0x1270   :  { %v2121_v62 = vmul.f32 %v3053_v61, %v2089_v32 }
0x1272   :  { %v2131_v1 = vmul.f32 %v2471_v60, %v2121_v62 }
0x1274   :  { %v2141_v16 = vadd.f32 %v2472_v0, %v2131_v1 }
0x1276   :  { %2731 = vmatprep.mubr.msk.f32.mxu1 %vm74_vm0, %v2141_v16 }
0x1277   :  { %2732 = vmatmul.mubr.msk.f32.vlgmr.msra.gmra.mrb[22].mxu1 %vm74_vm0, %v2142_v5 }
0x12ed   :  { %v2105_v22 = vpop.xlane.xlu0 %2104 }
0x12ee   :  { %v2111_v23 = vmul.f32 0.03125, %v2105_v22 }
0x12f0   :  { %v2115_v24 = vadd.f32 1e-06, %v2111_v23 }
0x12f1   :  { %v2108_v2 = vpop.xlane.xlu1 %2107 }
0x12f2   :  { %3054 = vrsqrt.f32 %v2115_v24  ;;  %v2112_v25 = vmul.f32 0.03125, %v2108_v2 }
0x12f4   :  { %v2116_v26 = vadd.f32 1e-06, %v2112_v25 }
0x12f6   :  { %3056 = vrsqrt.f32 %v2116_v26 }
0x12fc   :  { %v3055_v28 = vpop.eup %3054 }
0x12fd   :  { %v2123_v11 = vmul.f32 %v3055_v28, %v2091_v45 }
0x12ff   :  { %v2133_v27 = vmul.f32 %v2471_v60, %v2123_v11 }
0x1300   :  { %v3057_v18 = vpop.eup %3056 }
0x1301   :  { %v2143_v53 = vadd.f32 %v2472_v0, %v2133_v27  ;;  %v2124_v32 = vmul.f32 %v3057_v18, %v2092_v49 }
0x1303   :  { %2734 = vmatprep.mubr.msk.f32.mxu1 %vm74_vm0, %v2143_v53  ;;  %v2134_v56 = vmul.f32 %v2471_v60, %v2124_v32 }
0x1305   :  { %v2144_v33 = vadd.f32 %v2472_v0, %v2134_v56 }
0x1307   :  { %2735 = vmatmul.mubr.msk.f32.gmra.mrb[24].mxu1 %vm74_vm0, %v2144_v33 }
0x134a   :  { %v2733_v34 = vpop.f32.mrb[22].mxu1 }
0x134b   :  { %v2240_v29 = vadd.f32 %v2733_v34, %v2473_v55  ;;  %v2234_v35 = vpop.f32.mrb[23].mxu1 }
0x134c   :  { %v2235_v36 = vadd.f32 %v2473_v55, %v2234_v35 }
0x134d   :  { %v2258_v37 = vmul.f32 0.70710677, %v2240_v29  ;;  %v2254_v45 = vmul.f32 0.5, %v2240_v29 }
0x134e   :  { %v2257_v38 = vmul.f32 0.70710677, %v2235_v36  ;;  %v2253_v42 = vmul.f32 0.5, %v2235_v36 }
0x134f   :  { %3058 = verf.f32 %v2258_v37 }
0x1350   :  { %3060 = verf.f32 %v2257_v38 }
0x1359   :  { %v3059_v39 = vpop.eup %3058 }
0x135a   :  { %v3061_v40 = vpop.eup %3060  ;;  %v2266_v41 = vadd.f32 1.0, %v3059_v39 }
0x135b   :  { %v2265_v43 = vadd.f32 1.0, %v3061_v40 }
0x135c   :  { %v2270_v47 = vmul.f32 %v2266_v41, %v2254_v45 }
0x135d   :  { %v2269_v46 = vmul.f32 %v2265_v43, %v2253_v42 }
0x135f   :  { %2753 = vmatprep.mubr.msk.f32.mxu0 %vm2288_vm9, %v2269_v46 }
0x1360   :  { %2754 = vmatmul.mubr.msk.f32.vlgmr.msra.gmra.mrb[18].mxu0 %vm2288_vm9, %v2270_v47 }
0x13da   :  { %v2736_v54 = vpop.f32.mrb[24].mxu1 }
0x13db   :  { %v2250_v48 = vadd.f32 %v2736_v54, %v2473_v55  ;;  %v2244_v49 = vpop.f32.mrb[25].mxu1 }
0x13dc   :  { %v2245_v50 = vadd.f32 %v2473_v55, %v2244_v49 }
0x13dd   :  { %v2260_v51 = vmul.f32 0.70710677, %v2250_v48  ;;  %v2256_v60 = vmul.f32 0.5, %v2250_v48 }
0x13de   :  { %v2259_v30 = vmul.f32 0.70710677, %v2245_v50  ;;  %v2255_v58 = vmul.f32 0.5, %v2245_v50 }
0x13df   :  { %3062 = verf.f32 %v2260_v51 }
0x13e0   :  { %3064 = verf.f32 %v2259_v30 }
0x13e9   :  { %v3063_v44 = vpop.eup %3062 }
0x13ea   :  { %v3065_v52 = vpop.eup %3064  ;;  %v2268_v57 = vadd.f32 1.0, %v3063_v44 }
0x13eb   :  { %v2267_v59 = vadd.f32 1.0, %v3065_v52 }
0x13ec   :  { %v2272_v62 = vmul.f32 %v2268_v57, %v2256_v60 }
0x13ed   :  { %v2271_v61 = vmul.f32 %v2267_v59, %v2255_v58 }
0x13ef   :  { %2756 = vmatprep.mubr.msk.f32.mxu0 %vm2288_vm9, %v2271_v61 }
0x13f0   :  { %2757 = vmatmul.mubr.msk.f32.gmra.mrb[20].mxu0 %vm2288_vm9, %v2272_v62 }
0x1433   :  { %v2755_v0 = vpop.f32.mrb[18].mxu0 }
0x1434   :  { %v2373_v1 = vadd.f32 %v2755_v0, %v2478_v63  ;;  %v2367_v16 = vpop.f32.mrb[19].mxu0 }
0x1435   :  { %v2368_v5 = vadd.f32 %v2478_v63, %v2367_v16 }
0x1436   :  { %v2387_v17 = vadd.f32 %v2373_v1, %v3570_v10 }
0x1437   :  { %v2386_v6 = vadd.f32 %v2368_v5, %v3568_v9 }
0x1438   :  { %2391 = vst.msk [vmem:[#allocation9 + $0x8] sm:$0xff] %vm74_vm0, %v2387_v17 }
0x1439   :  { %2390 = vst.msk [vmem:[#allocation9] sm:$0xff] %vm74_vm0, %v2386_v6 }
0x14c3   :  { %v2758_v7 = vpop.f32.mrb[20].mxu0 }
0x14c4   :  { %v2383_v8 = vadd.f32 %v2758_v7, %v2478_v63  ;;  %v2377_v12 = vpop.f32.mrb[21].mxu0 }
0x14c5   :  { %v2378_v13 = vadd.f32 %v2478_v63, %v2377_v12 }
0x14c6   :  { %v2389_v14 = vadd.f32 %v2383_v8, %v3591_v3 }
0x14c7   :  { %v2388_v15 = vadd.f32 %v2378_v13, %v3588_v31 }
0x14c8   :  { %2393 = vst.msk [vmem:[#allocation9 + $0x18] sm:$0xff] %vm74_vm0, %v2389_v14 }
0x14c9   :  { %2392 = vst.msk [vmem:[#allocation9 + $0x10] sm:$0xff] %vm74_vm0, %v2388_v15 }
0x14ca   :  { %3125 = shalt.err (!%p3122_p6)
}
0x14cb   :  { %s3126_s18 = scalar_lea.hbm %s3678_s12, 512 }
0x14cc   :  { %p3127_p7 = scmp.ne.s32.totalorder %s3678_s12, %s3126_s18  ;;  %p3130_p8 = scmp.lt.u32.totalorder %s3126_s18, %s3678_s12 }
0x14ce   :  { %p3132_p9 = pnand %p3130_p8, %p3127_p7 }
0x14d0   :  { %3135 = shalt.err (!%p3132_p9)
}
0x14d1   :  { %2405 = dma.vmem_to_hbm [thread:$0]  %s2400_s7, 512, %s3678_s12, [#allocation6], %s3143_s13, %s3143_s13, %s3144_s14  }
0x14d2   :  { %3140 = dma.done.wait [#allocation6], 512  }
0x14d3   :  { %3141 = vsyncadd [#allocation6], 4294966784 }
0x14d4   :  { %2409 = vsyncpa [#allocation5], 1 }
0x14d5   :  { %2410 = vsyncpa [#allocation8], 1 }
0x14d6   :  { %2411 = vsyncpa [#allocation6], 1 }

</bundles_post_ra>
